<compile_context>
chip_gen: v7x
topology: tpu7x:2x2x1
jax: 0.10.0
libtpu: 0.0.40
codegen_flags: <defaults>
</compile_context>

<pallas_src>
import functools

import numpy as np
import jax
import jax.numpy as jnp
from jax.experimental import pallas as pl
from jax.experimental.pallas import tpu as pltpu


_VMEM_LIMIT = 64 * 1024 * 1024      # raised scoped-VMEM budget, still headroom on v7x


def _round_up(x, m):
    return ((x + m - 1) // m) * m


def _cpad(c):
    return _round_up(c, 128)


def _pick_kn_tile(d):
    # prefer 256-multiples (v6e 2x256x256 MXU), 384 covers the 384/768/2688 dims
    for c in (512, 256, 384, 128):
        if d % c == 0:
            return c
    return 128


def _pick_m_tile(m):
    if m <= 512:
        tm = _round_up(m, 16)
        return tm, tm                     # single M block
    for c in (512, 384, 256, 128):
        if m % c == 0:
            return c, m
    return 256, _round_up(m, 256)


# ----------------------------------------------------------------------------
# Pallas matmul kernel:  C = act(A @ B + bias [+ residual])   (bf16 in, f32 acc)
# ----------------------------------------------------------------------------
def _matmul_kernel(a_ref, b_ref, bias_ref, *rest, act, slope, has_res):
    if has_res:
        res_ref, o_ref, acc_ref = rest
    else:
        res_ref = None
        o_ref, acc_ref = rest

    k = pl.program_id(2)

    @pl.when(k == 0)
    def _():
        acc_ref[...] = jnp.zeros_like(acc_ref)

    acc_ref[...] += jnp.dot(a_ref[...], b_ref[...],
                            preferred_element_type=jnp.float32)

    @pl.when(k == pl.num_programs(2) - 1)
    def _():
        r = acc_ref[...] + bias_ref[...]
        if has_res:
            r = r + res_ref[...].astype(jnp.float32)
        if act == "leaky":
            r = jnp.where(r >= 0, r, r * slope)
        elif act == "relu":
            r = jnp.maximum(r, 0.0)
        elif act == "sigmoid":
            r = jax.nn.sigmoid(r)
        o_ref[...] = r.astype(o_ref.dtype)


def matmul_bias_act(a, b, bias, act="none", slope=1e-2, residual=None):
    """act(a @ b + bias [+ residual]); K and N must already be 128-padded."""
    M, K = a.shape
    K2, N = b.shape
    assert K == K2 and K % 128 == 0 and N % 128 == 0

    a = a.astype(jnp.bfloat16)
    b = b.astype(jnp.bfloat16)
    if residual is not None:
        residual = residual.astype(jnp.bfloat16)

    tm, Mp = _pick_m_tile(M)
    if Mp != M:                                    # only M is ever padded (cheap)
        a = jnp.pad(a, ((0, Mp - M), (0, 0)))
        if residual is not None:
            residual = jnp.pad(residual, ((0, Mp - M), (0, 0)))

    tk = _pick_kn_tile(K)
    tn = _pick_kn_tile(N)
    grid = (Mp // tm, N // tn, K // tk)

    in_specs = [
        pl.BlockSpec((tm, tk), lambda m, n, k: (m, k)),
        pl.BlockSpec((tk, tn), lambda m, n, k: (k, n)),
        pl.BlockSpec((1, tn), lambda m, n, k: (0, n)),
    ]
    inputs = [a, b, bias.astype(jnp.float32).reshape(1, N)]
    if residual is not None:
        in_specs.append(pl.BlockSpec((tm, tn), lambda m, n, k: (m, n)))
        inputs.append(residual)

    kernel = functools.partial(_matmul_kernel, act=act, slope=slope,
                               has_res=residual is not None)
    out = pl.pallas_call(
        kernel,
        out_shape=jax.ShapeDtypeStruct((Mp, N), jnp.bfloat16),
        grid_spec=pltpu.PrefetchScalarGridSpec(
            num_scalar_prefetch=0,
            grid=grid,
            in_specs=in_specs,
            out_specs=pl.BlockSpec((tm, tn), lambda m, n, k: (m, n)),
            scratch_shapes=[pltpu.VMEM((tm, tn), jnp.float32)],
        ),
        compiler_params=pltpu.CompilerParams(
            dimension_semantics=("parallel", "parallel", "arbitrary"),
            vmem_limit_bytes=_VMEM_LIMIT),
    )(*inputs)
    return out if Mp == M else out[:M]


# ----------------------------------------------------------------------------
# Pallas 3x3 conv kernel (stride 1): streams the 9 taps from a VMEM-resident
# spatially-padded activation block -- no materialized im2col in HBM.
# ----------------------------------------------------------------------------
def _conv3x3_kernel(x_ref, w_ref, b_ref, o_ref, *, H, W, act, slope):
    # x_ref: (1, H+2, W+2, Cinp) bf16; w_ref: (9, Cinp, tn) bf16
    # b_ref: (1, tn) f32;             o_ref: (1, H, W, tn) bf16
    cinp = w_ref.shape[1]
    tn = w_ref.shape[2]
    acc = jnp.zeros((H * W, tn), jnp.float32)
    for t in range(9):
        dy, dx = t // 3, t % 3
        a = x_ref[0, dy:dy + H, dx:dx + W, :].reshape(H * W, cinp)
        acc = acc + jnp.dot(a, w_ref[t], preferred_element_type=jnp.float32)
    r = acc + b_ref[...]
    if act == "leaky":
        r = jnp.where(r >= 0, r, r * slope)
    elif act == "relu":
        r = jnp.maximum(r, 0.0)
    o_ref[0] = r.reshape(H, W, tn).astype(o_ref.dtype)


def conv3x3_bias_act(x, w9, bias, act, slope):
    N, H, W, Cinp = x.shape
    Coutp = w9.shape[2]
    xp = jnp.pad(x, ((0, 0), (1, 1), (1, 1), (0, 0)))          # zero pad (same as Conv2d pad=1)
    tn = 256 if Coutp % 256 == 0 else 128
    kernel = functools.partial(_conv3x3_kernel, H=H, W=W, act=act, slope=slope)
    return pl.pallas_call(
        kernel,
        out_shape=jax.ShapeDtypeStruct((N, H, W, Coutp), jnp.bfloat16),
        grid_spec=pltpu.PrefetchScalarGridSpec(
            num_scalar_prefetch=0,
            grid=(N, Coutp // tn),
            in_specs=[
                pl.BlockSpec((1, H + 2, W + 2, Cinp), lambda b, n: (b, 0, 0, 0)),
                pl.BlockSpec((9, Cinp, tn), lambda b, n: (0, 0, n)),
                pl.BlockSpec((1, tn), lambda b, n: (0, n)),
            ],
            out_specs=pl.BlockSpec((1, H, W, tn), lambda b, n: (b, 0, 0, n)),
        ),
        compiler_params=pltpu.CompilerParams(
            dimension_semantics=("parallel", "arbitrary"),
            vmem_limit_bytes=_VMEM_LIMIT),
    )(xp, w9, bias.astype(jnp.float32).reshape(1, Coutp))


# ----------------------------------------------------------------------------
# Layers (all learned convs go through the two Pallas kernels above)
# ----------------------------------------------------------------------------
def conv_bn_act(x, p, act, slope=1e-2, residual=None):
    """p['w'] is pre-folded (BN scale), pre-transposed and channel-padded bf16."""
    w = p["w"]
    if w.ndim == 2:                                   # 1x1 conv -> tiled matmul
        N, H, W, Cin = x.shape
        coutp = w.shape[1]
        a = x.reshape(N * H * W, Cin)
        res = None if residual is None else residual.reshape(N * H * W, coutp)
        out = matmul_bias_act(a, w, p["bias"], act=act, slope=slope, residual=res)
        return out.reshape(N, H, W, coutp)
    return conv3x3_bias_act(x, w, p["bias"], act=act, slope=slope)


def blur_pool(x):
    # TODO(synk): BlurPool2d (fixed [1,2,1]x[1,2,1]/16 depthwise blur, stride 2)
    # kept as plain-JAX depthwise conv; negligible FLOPs.
    N, H, W, C = x.shape
    f = jnp.array([1.0, 2.0, 1.0], jnp.float32)
    k = jnp.outer(f, f)
    k = k / k.sum()
    kern = jnp.tile(k[:, :, None, None], (1, 1, 1, C))          # HWIO, groups=C
    xp = jnp.pad(x.astype(jnp.float32), ((0, 0), (1, 1), (1, 1), (0, 0)),
                 mode="reflect")
    y = jax.lax.conv_general_dilated(
        xp, kern, window_strides=(2, 2), padding="VALID",
        dimension_numbers=("NHWC", "HWIO", "NHWC"), feature_group_count=C)
    return y.astype(jnp.bfloat16)


def avg_pool2(x):
    N, H, W, C = x.shape
    y = x.astype(jnp.float32).reshape(N, H // 2, 2, W // 2, 2, C).mean(axis=(2, 4))
    return y.astype(jnp.bfloat16)


def se_module(x, p):
    # Tiny matmuls (M = batch): plain jnp.dot per perf review (skip Pallas pad/call cost).
    N, H, W, Cp = x.shape
    C = p["w1"].shape[1]
    s = x.astype(jnp.float32).mean(axis=(1, 2))[:, :C]          # squeeze (N, C)
    h = jax.nn.relu(jnp.dot(s, p["w1"].T) + p["b1"])
    g = jax.nn.sigmoid(jnp.dot(h, p["w2"].T) + p["b2"])
    g = jnp.pad(g, ((0, 0), (0, Cp - C)))
    return x * g.astype(x.dtype)[:, None, None, :]


def space_to_depth(x_nchw, bs=4):
    N, C, H, W = x_nchw.shape
    x = x_nchw.reshape(N, C, H // bs, bs, W // bs, bs)
    x = x.transpose(0, 3, 5, 1, 2, 4).reshape(N, C * bs * bs, H // bs, W // bs)
    return x.transpose(0, 2, 3, 1)                              # NCHW -> NHWC


def pad_channels(x, cp):
    c = x.shape[-1]
    if c == cp:
        return x
    return jnp.pad(x, ((0, 0),) * (x.ndim - 1) + ((0, cp - c),))


def basic_block(x, p, stride):
    if p["downsample"] is not None:
        sc = avg_pool2(x) if stride == 2 else x
        sc = conv_bn_act(sc, p["downsample"], act="none")
    else:
        sc = x
    out = conv_bn_act(x, p["conv1"], act="leaky", slope=1e-3)
    if stride == 2:
        out = blur_pool(out)
    out = conv_bn_act(out, p["conv2"], act="none")
    if p["se"] is not None:
        out = se_module(out, p["se"])
    # SE sits between conv2 and the residual, so add+ReLU stays in XLA (fused elementwise).
    return jnp.maximum(out + sc, 0).astype(jnp.bfloat16)


def bottleneck_block(x, p, stride):
    if p["downsample"] is not None:
        sc = avg_pool2(x) if stride == 2 else x
        sc = conv_bn_act(sc, p["downsample"], act="none")
    else:
        sc = x
    out = conv_bn_act(x, p["conv1"], act="leaky", slope=1e-3)
    out = conv_bn_act(out, p["conv2"], act="leaky", slope=1e-3)
    if stride == 2:
        out = blur_pool(out)
    if p["se"] is not None:
        out = se_module(out, p["se"])
    # conv3 + BN bias + residual add + ReLU fused in the matmul epilogue.
    return conv_bn_act(out, p["conv3"], act="relu", residual=sc)


# jit per block: identical blocks (e.g. the 24 layer3 blocks) share one compile,
# and XLA fuses the in-block glue (pads / SE gate / residual add).
_basic_block = jax.jit(basic_block, static_argnums=(2,))
_bottleneck_block = jax.jit(bottleneck_block, static_argnums=(2,))


# ----------------------------------------------------------------------------
# Deterministic synthetic parameter init (mirrors timm tresnet_xl shapes).
# BN scale is folded into the conv weights, which are stored pre-transposed,
# channel-padded (multiples of 128) and in bf16 -- the exact kernel layout.
# ----------------------------------------------------------------------------
class _KeyGen:
    def __init__(self, seed):
        self._key = jax.random.PRNGKey(seed)

    def __call__(self):
        self._key, k = jax.random.split(self._key)
        return k


def make_conv_bn(kg, cin, cout, k):
    fan_in = cin * k * k
    w = jax.random.normal(kg(), (cout, cin, k, k), jnp.float32) * (0.5 / np.sqrt(fan_in))
    gamma = 1.0 + 0.1 * jax.random.normal(kg(), (cout,), jnp.float32)
    beta = 0.05 * jax.random.normal(kg(), (cout,), jnp.float32)
    mean = 0.05 * jax.random.normal(kg(), (cout,), jnp.float32)
    var = 1.0 + 0.1 * jnp.abs(jax.random.normal(kg(), (cout,), jnp.float32))
    s = gamma / jnp.sqrt(var + 1e-5)                      # inference-time BN fold
    wf = w * s[:, None, None, None]
    bias = beta - mean * s
    cinp, coutp = _cpad(cin), _cpad(cout)
    if k == 1:
        wm = wf.reshape(cout, cin).T                      # (cin, cout)
        wm = jnp.pad(wm, ((0, cinp - cin), (0, coutp - cout)))
    else:
        wm = jnp.transpose(wf, (2, 3, 1, 0)).reshape(k * k, cin, cout)  # (9, cin, cout)
        wm = jnp.pad(wm, ((0, 0), (0, cinp - cin), (0, coutp - cout)))
    return {"w": wm.astype(jnp.bfloat16),
            "bias": jnp.pad(bias, (0, coutp - cout))}


def make_se(kg, c, rd):
    return {
        "w1": jax.random.normal(kg(), (rd, c), jnp.float32) / np.sqrt(c),
        "b1": 0.01 * jax.random.normal(kg(), (rd,), jnp.float32),
        "w2": jax.random.normal(kg(), (c, rd), jnp.float32) / np.sqrt(rd),
        "b2": 0.01 * jax.random.normal(kg(), (c,), jnp.float32),
    }


def init_tresnet_xl_params(seed=0, num_classes=60, in_chans=3, width_factor=1.3):
    kg = _KeyGen(seed)
    planes = int(64 * width_factor)                       # 83
    layers = [4, 5, 24, 3]                                # tresnet_xl
    params = {"stem": make_conv_bn(kg, in_chans * 16, planes, 3)}
    inplanes = planes

    def make_layer(block, planes_, nblocks, stride, use_se):
        nonlocal inplanes
        expansion = 1 if block == "basic" else 4
        out = []
        for i in range(nblocks):
            bstride = stride if i == 0 else 1
            need_ds = (bstride != 1) or (inplanes != planes_ * expansion)
            p = {"downsample": None, "se": None}
            if need_ds:
                p["downsample"] = make_conv_bn(kg, inplanes, planes_ * expansion, 1)
            if block == "basic":
                p["conv1"] = make_conv_bn(kg, inplanes, planes_, 3)
                p["conv2"] = make_conv_bn(kg, planes_, planes_, 3)
                if use_se:
                    p["se"] = make_se(kg, planes_ * expansion,
                                      max(planes_ * expansion // 4, 64))
            else:
                p["conv1"] = make_conv_bn(kg, inplanes, planes_, 1)
                p["conv2"] = make_conv_bn(kg, planes_, planes_, 3)
                if use_se:
                    p["se"] = make_se(kg, planes_, max(planes_ * 4 // 8, 64))
                p["conv3"] = make_conv_bn(kg, planes_, planes_ * 4, 1)
            out.append(p)
            inplanes = planes_ * expansion
        return out

    params["layer1"] = make_layer("basic", planes, layers[0], 1, True)
    params["layer2"] = make_layer("basic", planes * 2, layers[1], 2, True)
    params["layer3"] = make_layer("bottleneck", planes * 4, layers[2], 2, True)
    params["layer4"] = make_layer("bottleneck", planes * 8, layers[3], 2, False)

    num_features = planes * 8 * 4                         # 2656
    params["fc_w"] = (jax.random.normal(kg(), (num_classes, num_features), jnp.float32)
                      / np.sqrt(num_features))
    params["fc_b"] = 0.01 * jax.random.normal(kg(), (num_classes,), jnp.float32)
    return params


# ----------------------------------------------------------------------------
# Forward pass (matches timm TResNet-XL forward + Linear(2656, 60) head)
# ----------------------------------------------------------------------------
def tresnet_xl_forward(images_nchw, params):
    x = space_to_depth(images_nchw.astype(jnp.float32))             # (N, H/4, W/4, 48)
    x = pad_channels(x, _cpad(x.shape[-1])).astype(jnp.bfloat16)    # 48 -> 128, bf16
    x = conv_bn_act(x, params["stem"], act="leaky", slope=1e-2)     # conv1 + IABN
    for p in params["layer1"]:
        x = _basic_block(x, p, 1)
    for i, p in enumerate(params["layer2"]):
        x = _basic_block(x, p, 2 if i == 0 else 1)
    for i, p in enumerate(params["layer3"]):
        x = _bottleneck_block(x, p, 2 if i == 0 else 1)
    for i, p in enumerate(params["layer4"]):
        x = _bottleneck_block(x, p, 2 if i == 0 else 1)
    feat = x.astype(jnp.float32).mean(axis=(1, 2))[:, :2656]        # 'fast' global pool
    # Final FC (M=batch, N=60): tiny -> plain jnp.dot per perf review.
    return jnp.dot(feat, params["fc_w"].T) + params["fc_b"]         # (N, 60)


if __name__ == "__main__":
    # Smallest valid spatial size: SpaceToDepth(/4) + three stride-2 stages -> /32.
    images = jax.random.normal(jax.random.PRNGKey(0), (2, 3, 32, 32), jnp.float32)
    params = init_tresnet_xl_params(seed=0, num_classes=60)
    out = jax.block_until_ready(tresnet_xl_forward(images, params))
    assert out.shape == (2, 60)
    assert bool(jnp.all(jnp.isfinite(out)))
    print("KERNEL_OK")
</pallas_src>

<mosaic_0001>
module attributes {stable_mosaic.version = 11 : i64} {
  func.func @_conv3x3_kernel(%arg0: i32, %arg1: i32, %arg2: memref<1x10x10x128xbf16, #tpu.memory_space<vmem>>, %arg3: memref<9x128x128xbf16, #tpu.memory_space<vmem>>, %arg4: memref<1x128xf32, #tpu.memory_space<vmem>>, %arg5: memref<1x8x8x128xbf16, #tpu.memory_space<vmem>>) attributes {dimension_semantics = [#tpu.dimension_semantics<parallel>, #tpu.dimension_semantics<arbitrary>], iteration_bounds = array<i64: 2, 1>, scalar_prefetch = 0 : i64, scratch_operands = 0 : i64, tpu.core_type = #tpu.core_type<tc>, window_params = [{transform_indices = @transform_0, window_bounds = array<i64: 1, 10, 10, 128>}, {transform_indices = @transform_1, window_bounds = array<i64: 9, 128, 128>}, {transform_indices = @transform_2, window_bounds = array<i64: 1, 128>}, {transform_indices = @transform_3, window_bounds = array<i64: 1, 8, 8, 128>}]} {
    %cst = arith.constant 0.000000e+00 : f32
    %0 = vector.broadcast %cst : f32 to vector<64x128xf32>
    %c0 = arith.constant 0 : index
    %c0_0 = arith.constant 0 : index
    %c0_1 = arith.constant 0 : index
    %c0_2 = arith.constant 0 : index
    %1 = vector.load %arg2[%c0, %c0_0, %c0_1, %c0_2] : memref<1x10x10x128xbf16, #tpu.memory_space<vmem>>, vector<1x8x8x128xbf16>
    %2 = vector.shape_cast %1 : vector<1x8x8x128xbf16> to vector<8x8x128xbf16>
    %3 = vector.shape_cast %2 : vector<8x8x128xbf16> to vector<64x128xbf16>
    %c0_3 = arith.constant 0 : index
    %c0_4 = arith.constant 0 : index
    %c0_5 = arith.constant 0 : index
    %4 = vector.load %arg3[%c0_3, %c0_4, %c0_5] : memref<9x128x128xbf16, #tpu.memory_space<vmem>>, vector<1x128x128xbf16>
    %5 = vector.shape_cast %4 : vector<1x128x128xbf16> to vector<128x128xbf16>
    %cst_6 = arith.constant dense<0.000000e+00> : vector<64x128xf32>
    %6 = tpu.matmul %3, %5, %cst_6 {dimension_numbers = #tpu.dot_dimension_numbers<[1], [0], [0], [1], [0, 0, 1, 1], [], []>} : vector<64x128xbf16>, vector<128x128xbf16>, vector<64x128xf32> -> vector<64x128xf32>
    %7 = arith.addf %0, %6 : vector<64x128xf32>
    %c0_7 = arith.constant 0 : index
    %c0_8 = arith.constant 0 : index
    %c1 = arith.constant 1 : index
    %c0_9 = arith.constant 0 : index
    %8 = vector.load %arg2[%c0_7, %c0_8, %c1, %c0_9] : memref<1x10x10x128xbf16, #tpu.memory_space<vmem>>, vector<1x8x8x128xbf16>
    %9 = vector.shape_cast %8 : vector<1x8x8x128xbf16> to vector<8x8x128xbf16>
    %10 = vector.shape_cast %9 : vector<8x8x128xbf16> to vector<64x128xbf16>
    %c1_10 = arith.constant 1 : index
    %c0_11 = arith.constant 0 : index
    %c0_12 = arith.constant 0 : index
    %11 = vector.load %arg3[%c1_10, %c0_11, %c0_12] : memref<9x128x128xbf16, #tpu.memory_space<vmem>>, vector<1x128x128xbf16>
    %12 = vector.shape_cast %11 : vector<1x128x128xbf16> to vector<128x128xbf16>
    %cst_13 = arith.constant dense<0.000000e+00> : vector<64x128xf32>
    %13 = tpu.matmul %10, %12, %cst_13 {dimension_numbers = #tpu.dot_dimension_numbers<[1], [0], [0], [1], [0, 0, 1, 1], [], []>} : vector<64x128xbf16>, vector<128x128xbf16>, vector<64x128xf32> -> vector<64x128xf32>
    %14 = arith.addf %7, %13 : vector<64x128xf32>
    %c0_14 = arith.constant 0 : index
    %c0_15 = arith.constant 0 : index
    %c2 = arith.constant 2 : index
    %c0_16 = arith.constant 0 : index
    %15 = vector.load %arg2[%c0_14, %c0_15, %c2, %c0_16] : memref<1x10x10x128xbf16, #tpu.memory_space<vmem>>, vector<1x8x8x128xbf16>
    %16 = vector.shape_cast %15 : vector<1x8x8x128xbf16> to vector<8x8x128xbf16>
    %17 = vector.shape_cast %16 : vector<8x8x128xbf16> to vector<64x128xbf16>
    %c2_17 = arith.constant 2 : index
    %c0_18 = arith.constant 0 : index
    %c0_19 = arith.constant 0 : index
    %18 = vector.load %arg3[%c2_17, %c0_18, %c0_19] : memref<9x128x128xbf16, #tpu.memory_space<vmem>>, vector<1x128x128xbf16>
    %19 = vector.shape_cast %18 : vector<1x128x128xbf16> to vector<128x128xbf16>
    %cst_20 = arith.constant dense<0.000000e+00> : vector<64x128xf32>
    %20 = tpu.matmul %17, %19, %cst_20 {dimension_numbers = #tpu.dot_dimension_numbers<[1], [0], [0], [1], [0, 0, 1, 1], [], []>} : vector<64x128xbf16>, vector<128x128xbf16>, vector<64x128xf32> -> vector<64x128xf32>
    %21 = arith.addf %14, %20 : vector<64x128xf32>
    %c0_21 = arith.constant 0 : index
    %c1_22 = arith.constant 1 : index
    %c0_23 = arith.constant 0 : index
    %c0_24 = arith.constant 0 : index
    %22 = vector.load %arg2[%c0_21, %c1_22, %c0_23, %c0_24] : memref<1x10x10x128xbf16, #tpu.memory_space<vmem>>, vector<1x8x8x128xbf16>
    %23 = vector.shape_cast %22 : vector<1x8x8x128xbf16> to vector<8x8x128xbf16>
    %24 = vector.shape_cast %23 : vector<8x8x128xbf16> to vector<64x128xbf16>
    %c3 = arith.constant 3 : index
    %c0_25 = arith.constant 0 : index
    %c0_26 = arith.constant 0 : index
    %25 = vector.load %arg3[%c3, %c0_25, %c0_26] : memref<9x128x128xbf16, #tpu.memory_space<vmem>>, vector<1x128x128xbf16>
    %26 = vector.shape_cast %25 : vector<1x128x128xbf16> to vector<128x128xbf16>
    %cst_27 = arith.constant dense<0.000000e+00> : vector<64x128xf32>
    %27 = tpu.matmul %24, %26, %cst_27 {dimension_numbers = #tpu.dot_dimension_numbers<[1], [0], [0], [1], [0, 0, 1, 1], [], []>} : vector<64x128xbf16>, vector<128x128xbf16>, vector<64x128xf32> -> vector<64x128xf32>
    %28 = arith.addf %21, %27 : vector<64x128xf32>
    %c0_28 = arith.constant 0 : index
    %c1_29 = arith.constant 1 : index
    %c1_30 = arith.constant 1 : index
    %c0_31 = arith.constant 0 : index
    %29 = vector.load %arg2[%c0_28, %c1_29, %c1_30, %c0_31] : memref<1x10x10x128xbf16, #tpu.memory_space<vmem>>, vector<1x8x8x128xbf16>
    %30 = vector.shape_cast %29 : vector<1x8x8x128xbf16> to vector<8x8x128xbf16>
    %31 = vector.shape_cast %30 : vector<8x8x128xbf16> to vector<64x128xbf16>
    %c4 = arith.constant 4 : index
    %c0_32 = arith.constant 0 : index
    %c0_33 = arith.constant 0 : index
    %32 = vector.load %arg3[%c4, %c0_32, %c0_33] : memref<9x128x128xbf16, #tpu.memory_space<vmem>>, vector<1x128x128xbf16>
    %33 = vector.shape_cast %32 : vector<1x128x128xbf16> to vector<128x128xbf16>
    %cst_34 = arith.constant dense<0.000000e+00> : vector<64x128xf32>
    %34 = tpu.matmul %31, %33, %cst_34 {dimension_numbers = #tpu.dot_dimension_numbers<[1], [0], [0], [1], [0, 0, 1, 1], [], []>} : vector<64x128xbf16>, vector<128x128xbf16>, vector<64x128xf32> -> vector<64x128xf32>
    %35 = arith.addf %28, %34 : vector<64x128xf32>
    %c0_35 = arith.constant 0 : index
    %c1_36 = arith.constant 1 : index
    %c2_37 = arith.constant 2 : index
    %c0_38 = arith.constant 0 : index
    %36 = vector.load %arg2[%c0_35, %c1_36, %c2_37, %c0_38] : memref<1x10x10x128xbf16, #tpu.memory_space<vmem>>, vector<1x8x8x128xbf16>
    %37 = vector.shape_cast %36 : vector<1x8x8x128xbf16> to vector<8x8x128xbf16>
    %38 = vector.shape_cast %37 : vector<8x8x128xbf16> to vector<64x128xbf16>
    %c5 = arith.constant 5 : index
    %c0_39 = arith.constant 0 : index
    %c0_40 = arith.constant 0 : index
    %39 = vector.load %arg3[%c5, %c0_39, %c0_40] : memref<9x128x128xbf16, #tpu.memory_space<vmem>>, vector<1x128x128xbf16>
    %40 = vector.shape_cast %39 : vector<1x128x128xbf16> to vector<128x128xbf16>
    %cst_41 = arith.constant dense<0.000000e+00> : vector<64x128xf32>
    %41 = tpu.matmul %38, %40, %cst_41 {dimension_numbers = #tpu.dot_dimension_numbers<[1], [0], [0], [1], [0, 0, 1, 1], [], []>} : vector<64x128xbf16>, vector<128x128xbf16>, vector<64x128xf32> -> vector<64x128xf32>
    %42 = arith.addf %35, %41 : vector<64x128xf32>
    %c0_42 = arith.constant 0 : index
    %c2_43 = arith.constant 2 : index
    %c0_44 = arith.constant 0 : index
    %c0_45 = arith.constant 0 : index
    %43 = vector.load %arg2[%c0_42, %c2_43, %c0_44, %c0_45] : memref<1x10x10x128xbf16, #tpu.memory_space<vmem>>, vector<1x8x8x128xbf16>
    %44 = vector.shape_cast %43 : vector<1x8x8x128xbf16> to vector<8x8x128xbf16>
    %45 = vector.shape_cast %44 : vector<8x8x128xbf16> to vector<64x128xbf16>
    %c6 = arith.constant 6 : index
    %c0_46 = arith.constant 0 : index
    %c0_47 = arith.constant 0 : index
    %46 = vector.load %arg3[%c6, %c0_46, %c0_47] : memref<9x128x128xbf16, #tpu.memory_space<vmem>>, vector<1x128x128xbf16>
    %47 = vector.shape_cast %46 : vector<1x128x128xbf16> to vector<128x128xbf16>
    %cst_48 = arith.constant dense<0.000000e+00> : vector<64x128xf32>
    %48 = tpu.matmul %45, %47, %cst_48 {dimension_numbers = #tpu.dot_dimension_numbers<[1], [0], [0], [1], [0, 0, 1, 1], [], []>} : vector<64x128xbf16>, vector<128x128xbf16>, vector<64x128xf32> -> vector<64x128xf32>
    %49 = arith.addf %42, %48 : vector<64x128xf32>
    %c0_49 = arith.constant 0 : index
    %c2_50 = arith.constant 2 : index
    %c1_51 = arith.constant 1 : index
    %c0_52 = arith.constant 0 : index
    %50 = vector.load %arg2[%c0_49, %c2_50, %c1_51, %c0_52] : memref<1x10x10x128xbf16, #tpu.memory_space<vmem>>, vector<1x8x8x128xbf16>
    %51 = vector.shape_cast %50 : vector<1x8x8x128xbf16> to vector<8x8x128xbf16>
    %52 = vector.shape_cast %51 : vector<8x8x128xbf16> to vector<64x128xbf16>
    %c7 = arith.constant 7 : index
    %c0_53 = arith.constant 0 : index
    %c0_54 = arith.constant 0 : index
    %53 = vector.load %arg3[%c7, %c0_53, %c0_54] : memref<9x128x128xbf16, #tpu.memory_space<vmem>>, vector<1x128x128xbf16>
    %54 = vector.shape_cast %53 : vector<1x128x128xbf16> to vector<128x128xbf16>
    %cst_55 = arith.constant dense<0.000000e+00> : vector<64x128xf32>
    %55 = tpu.matmul %52, %54, %cst_55 {dimension_numbers = #tpu.dot_dimension_numbers<[1], [0], [0], [1], [0, 0, 1, 1], [], []>} : vector<64x128xbf16>, vector<128x128xbf16>, vector<64x128xf32> -> vector<64x128xf32>
    %56 = arith.addf %49, %55 : vector<64x128xf32>
    %c0_56 = arith.constant 0 : index
    %c2_57 = arith.constant 2 : index
    %c2_58 = arith.constant 2 : index
    %c0_59 = arith.constant 0 : index
    %57 = vector.load %arg2[%c0_56, %c2_57, %c2_58, %c0_59] : memref<1x10x10x128xbf16, #tpu.memory_space<vmem>>, vector<1x8x8x128xbf16>
    %58 = vector.shape_cast %57 : vector<1x8x8x128xbf16> to vector<8x8x128xbf16>
    %59 = vector.shape_cast %58 : vector<8x8x128xbf16> to vector<64x128xbf16>
    %c8 = arith.constant 8 : index
    %c0_60 = arith.constant 0 : index
    %c0_61 = arith.constant 0 : index
    %60 = vector.load %arg3[%c8, %c0_60, %c0_61] : memref<9x128x128xbf16, #tpu.memory_space<vmem>>, vector<1x128x128xbf16>
    %61 = vector.shape_cast %60 : vector<1x128x128xbf16> to vector<128x128xbf16>
    %cst_62 = arith.constant dense<0.000000e+00> : vector<64x128xf32>
    %62 = tpu.matmul %59, %61, %cst_62 {dimension_numbers = #tpu.dot_dimension_numbers<[1], [0], [0], [1], [0, 0, 1, 1], [], []>} : vector<64x128xbf16>, vector<128x128xbf16>, vector<64x128xf32> -> vector<64x128xf32>
    %63 = arith.addf %56, %62 : vector<64x128xf32>
    %c0_63 = arith.constant 0 : index
    %c0_64 = arith.constant 0 : index
    %64 = vector.load %arg4[%c0_63, %c0_64] : memref<1x128xf32, #tpu.memory_space<vmem>>, vector<1x128xf32>
    %65 = vector.broadcast %64 : vector<1x128xf32> to vector<64x128xf32>
    %66 = arith.addf %63, %65 : vector<64x128xf32>
    %cst_65 = arith.constant 0.000000e+00 : f32
    %67 = vector.broadcast %cst_65 : f32 to vector<64x128xf32>
    %68 = arith.cmpf oge, %66, %67 : vector<64x128xf32>
    %cst_66 = arith.constant 0.00999999977 : f32
    %69 = vector.broadcast %cst_66 : f32 to vector<64x128xf32>
    %70 = arith.mulf %66, %69 : vector<64x128xf32>
    %71 = arith.select %68, %66, %70 : vector<64x128xi1>, vector<64x128xf32>
    %72 = vector.shape_cast %71 : vector<64x128xf32> to vector<8x8x128xf32>
    %73 = arith.truncf %72 : vector<8x8x128xf32> to vector<8x8x128xbf16>
    %c0_67 = arith.constant 0 : index
    %c0_68 = arith.constant 0 : index
    %c0_69 = arith.constant 0 : index
    %c0_70 = arith.constant 0 : index
    %74 = vector.load %arg5[%c0_67, %c0_68, %c0_69, %c0_70] : memref<1x8x8x128xbf16, #tpu.memory_space<vmem>>, vector<1x8x8x128xbf16>
    %75 = vector.shape_cast %74 : vector<1x8x8x128xbf16> to vector<8x8x128xbf16>
    %76 = vector.shape_cast %73 : vector<8x8x128xbf16> to vector<1x8x8x128xbf16>
    tpu.vector_store %arg5[%c0_67, %c0_68, %c0_69, %c0_70], %76 {strides = array<i32>} : memref<1x8x8x128xbf16, #tpu.memory_space<vmem>>, vector<1x8x8x128xbf16>,
    return
  }
  func.func @transform_0(%arg0: i32, %arg1: i32) -> (i32, i32, i32, i32) {
    %c0_i32 = arith.constant 0 : i32
    %c0_i32_0 = arith.constant 0 : i32
    %c0_i32_1 = arith.constant 0 : i32
    %c0_i32_2 = arith.constant 0 : i32
    return %arg0, %c0_i32, %c0_i32_0, %c0_i32_1 : i32, i32, i32, i32
  }
  func.func @transform_1(%arg0: i32, %arg1: i32) -> (i32, i32, i32) {
    %c0_i32 = arith.constant 0 : i32
    %c0_i32_0 = arith.constant 0 : i32
    %c0_i32_1 = arith.constant 0 : i32
    return %c0_i32, %c0_i32_0, %arg1 : i32, i32, i32
  }
  func.func @transform_2(%arg0: i32, %arg1: i32) -> (i32, i32) {
    %c0_i32 = arith.constant 0 : i32
    %c0_i32_0 = arith.constant 0 : i32
    return %c0_i32, %arg1 : i32, i32
  }
  func.func @transform_3(%arg0: i32, %arg1: i32) -> (i32, i32, i32, i32) {
    %c0_i32 = arith.constant 0 : i32
    %c0_i32_0 = arith.constant 0 : i32
    %c0_i32_1 = arith.constant 0 : i32
    return %arg0, %c0_i32, %c0_i32_0, %arg1 : i32, i32, i32, i32
  }
}

</mosaic_0001>

<bundles_post_ra>
// kernel: tpu_custom_call.1
= control target key start
LH: loop header
LB: loop body
LE: loop exit
PB: predicated region body
PF: predicated region fallthrough
CT: control target
= control target key end

     0   :  { %8 = vsyncpa [#allocation3], 0  ;;  %s4002_s0 = inlined_call_operand.hbm [shape: bf16[2,10,10,128], index: 0, kind: input, shape index: {}]   ;;  %s4003_s1 = inlined_call_operand.hbm [shape: bf16[9,128,128], index: 1, kind: input, shape index: {}]   ;;  %s4004_s2 = inlined_call_operand.hbm [shape: f32[1,128], index: 2, kind: input, shape index: {}]   ;;  %s4005_s3 = inlined_call_operand.hbm [shape: bf16[2,8,8,128], index: 3, kind: output, shape index: {}]  }
   0x1   :  { %10 = vsyncpa [#allocation3 + $0x1], 0 }
   0x2   :  { %11 = vsyncpa [#allocation6], 0 }
   0x3   :  { %12 = vsyncpa [#allocation4], 0 }
   0x4   :  { %14 = vsyncpa [#allocation4 + $0x1], 0  ;;  %s3407_s12 = smov 0   ;;  %s3409_s13 = smov 0  }
   0x5   :  { %s3411_s14 = smov 0   ;;  %s3413_s15 = smov 0  }
   0x6   :  { %s3415_s16 = smov 0   ;;  %s3417_s17 = smov 0  }
   0x7 LB: > { %s2390_s18 = sadd.s32 4294967295, %s3377_s17   ;;  %s2391_s19 = sadd.s32 4294967294, %s3377_s17   ;;  %s3377_s17 = sphi %s3417_s17, %s20_s17   ;;  %s3373_s16 = sphi %s3415_s16, %s4031_s16   ;;  %s3369_s15 = sphi %s3413_s15, %s4030_s15   ;;  %s3365_s14 = sphi %s3411_s14, %s4029_s14   ;;  %s3361_s13 = sphi %s3409_s13, %s4028_s13   ;;  %s3357_s12 = sphi %s3407_s12, %s4027_s12  }
   0x8   : > { %p52_p0 = scmp.ne.s32.totalorder %s3361_s13, %s3357_s12  ;;  %p3441_p1 = scmp.eq.s32.totalorder %s2390_s18, 0 }
   0x9   : > { %p3445_p2 = scmp.eq.s32.totalorder %s2390_s18, 1  ;;  %p136_p3 = scmp.eq.s32.totalorder %s2391_s19, 1 }
   0xa   : > { %s4010_s20 = scalar_select %p3441_p1, 1, 0 }
   0xb   : > { %p3451_p4 = por %p3441_p1, %p52_p0  ;;  %p2392_p5 = scmp.ge.s32.totalorder %s3377_s17, 1 }
   0xc   : > { %p3456_p6 = por %p136_p3, %p52_p0  ;;  %p143_p7 = scmp.lt.s32.totalorder %s3377_s17, 3 }
   0xd   : > { %s4012_s22 = scalar_select %p3451_p4, 1, 0 }
   0xe   : > { %s4013_s23 = scalar_select %p3456_p6, 1, 0 }
   0xf   : > { %p3461_p8 = pnand %p2392_p5, %p143_p7  ;;  %s3379_s25 = smov [#allocation5]  }
  0x10   : > { %s157_s26 = sshll.u32 %s3379_s25, 4  ;;  %s3380_s28 = smov [#allocation7]   ;;  %s3465_s26 = int_to_ptr.vmem [resolvable:$true] %s157_s26 }
  0x11   : > { %p3046_p9 = pneg %p3461_p8  ;;  %s173_s29 = sshll.u32 %s3380_s28, 4  ;;  %s3476_s29 = int_to_ptr.vmem [resolvable:$true] %s173_s29 }
  0x12   : > { %s3205_s5 = scalar_lea.hbm %s4003_s1, 9216 }
  0x13   : > { %p3472_p11 = pnand %p3046_p9, %p3441_p1  ;;  %p3206_p12 = scmp.ne.s32.totalorder %s4003_s1, %s3205_s5 }
  0x14   : > { %p3212_p5 = scmp.lt.u32.totalorder %s3205_s5, %s4003_s1 }
  0x15   : > { %p3207_p13 = pneg %p3472_p11 }
  0x17   : > { %p3208_p0 = pnand %p3207_p13, %p3206_p12 }
  0x19   : > { %p3209_p3 = pneg %p3208_p0 }
  0x1b   : > { %p3214_p7 = pnand %p3212_p5, %p3209_p3 }
  0x1d   : > { %3217 = shalt.err (!%p3214_p7)
}
  0x1e   : > { %s3218_s10 = scalar_lea.vmem %s3465_s26, 9216  ;;  %p3226_p1 = scmp.lt.s32.totalorder %s3465_s26, %s3465_s26 }
  0x1f   : > { %p3219_p9 = scmp.ne.s32.totalorder %s3465_s26, %s3218_s10  ;;  %p3227_p12 = scmp.lt.s32.totalorder %s3218_s10, %s3218_s10 }
  0x21   : > { %p3221_p10 = pnand %p3219_p9, %p3207_p13  ;;  %p3228_p0 = por %p3227_p12, %p3226_p1 }
  0x23   : > { %p3222_p6 = pneg %p3221_p10 }
  0x25   : > { %p3229_p4 = pnand %p3228_p0, %p3222_p6 }
  0x27   : > { %3232 = shalt.err (!%p3229_p4)
}
  0x28   : > { %s3381_s11 = smov 64   ;;  %s3382_s18 = smov 4  }
  0x29   : > { %3049 = dma.hbm_to_vmem [thread:$0]  (!%p3472_p11), %s4003_s1, 9216, %s3465_s26, [#allocation6], %s3381_s11, %s3381_s11, %s3382_s18  }
  0x2a   : > { %s3233_s4 = scalar_lea.hbm %s4004_s2, 16 }
  0x2b   : > { %p3234_p1 = scmp.ne.s32.totalorder %s4004_s2, %s3233_s4  ;;  %p3240_p10 = scmp.lt.u32.totalorder %s3233_s4, %s4004_s2 }
  0x2d   : > { %p3236_p4 = pnand %p3234_p1, %p3207_p13 }
  0x2f   : > { %p3237_p6 = pneg %p3236_p4 }
  0x31   : > { %p3242_p3 = pnand %p3240_p10, %p3237_p6 }
  0x33   : > { %3245 = shalt.err (!%p3242_p3)
}
  0x34   : > { %s3246_s26 = scalar_lea.vmem %s3476_s29, 16  ;;  %s3253_s9 = scalar_lea.vmem %s3476_s29, 32 }
  0x35   : > { %p3247_p5 = scmp.ne.s32.totalorder %s3476_s29, %s3246_s26  ;;  %p3254_p12 = scmp.lt.s32.totalorder %s3476_s29, %s3476_s29 }
  0x36   : > { %p3255_p0 = scmp.lt.s32.totalorder %s3253_s9, %s3246_s26 }
  0x37   : > { %p3249_p7 = pnand %p3247_p5, %p3207_p13 }
  0x38   : > { %p3256_p1 = por %p3255_p0, %p3254_p12 }
  0x39   : > { %p3250_p9 = pneg %p3249_p7 }
  0x3b   : > { %p3257_p4 = pnand %p3256_p1, %p3250_p9 }
  0x3d   : > { %3260 = shalt.err (!%p3257_p4)
}
  0x3e   : > { %3052 = dma.hbm_to_vmem [thread:$0]  (!%p3472_p11), %s4004_s2, 16, %s3476_s29, [#allocation6]  }
  0x3f   : > { %s32_s25 = sadd.s32 1, %s3373_s16  ;;  %s39_s28 = sadd.s32 1, %s3365_s14 }
  0x40   : > { %p34_p13 = scmp.ge.s32.totalorder %s32_s25, 2  ;;  %p46_p6 = scmp.ne.s32.totalorder %s3365_s14, %s3361_s13 }
  0x41   : > { %p47_p10 = scmp.eq.s32.totalorder %s3377_s17, 0  ;;  %p3063_p3 = scmp.lt.s32.totalorder %s3377_s17, 2 }
  0x42   : > { %s4033_s25 = smov (%p34_p13, %s32_s25), 0  ;;  %p3544_p7 = por %p3445_p2, %p46_p6 }
  0x43   : > { %p48_p5 = por %p47_p10, %p46_p6  ;;  %s36_s30 = ssub.s32 %s3373_s16, %s4033_s25 }
  0x44   : > { %s4016_s27 = scalar_select %p3544_p7, 1, 0 }
  0x45   : > { %s184_s4 = sand.u32 1, %s3365_s14   ;;  %p37_p9 = scmp.eq.s32.totalorder %s36_s30, 0 }
  0x46   : > { %s3031_s29 = smul.u32 80, %s184_s4  ;;  %p3551_p11 = pnand %p3063_p3, %p48_p5 }
  0x47   : > { %s3556_s6 = scalar_select %p37_p9, %s3365_s14, %s39_s28  }
  0x48   : > { %s3032_s7 = smul.u32 1280, %s3373_s16  ;;  %s188_s8 = scalar_lea.vmem [#allocation2], %s3031_s29 }
  0x49   : > { %s195_s26 = sshll.u32 %s188_s8, 4  ;;  %s3566_s19 = scalar_lea.sflag [#allocation3], %s184_s4  ;;  %s3564_s26 = int_to_ptr.vmem [resolvable:$true] %s195_s26 }
  0x4a   : > { %s3562_s10 = scalar_lea.hbm %s4002_s0, %s3032_s7  ;;  %p3263_p12 = pneg %p3551_p11 }
  0x4b   : > { %s3261_s30 = scalar_lea.hbm %s3562_s10, 1280  ;;  %s3266_s7 = scalar_lea.hbm %s4002_s0, 2560 }
  0x4c   : > { %p3262_p2 = scmp.ne.s32.totalorder %s3562_s10, %s3261_s30  ;;  %p3267_p4 = scmp.lt.u32.totalorder %s3562_s10, %s4002_s0 }
  0x4d   : > { %p3268_p13 = scmp.lt.u32.totalorder %s3266_s7, %s3261_s30  ;;  %p3270_p10 = scmp.lt.u32.totalorder %s3261_s30, %s3562_s10 }
  0x4e   : > { %p3264_p0 = pnand %p3263_p12, %p3262_p2 }
  0x4f   : > { %p3269_p6 = por %p3268_p13, %p3267_p4 }
  0x50   : > { %p3265_p1 = pneg %p3264_p0 }
  0x51   : > { %p3271_p3 = por %p3270_p10, %p3269_p6 }
  0x53   : > { %p3272_p5 = pnand %p3271_p3, %p3265_p1 }
  0x55   : > { %3275 = shalt.err (!%p3272_p5)
}
  0x56   : > { %s3276_s4 = scalar_lea.vmem %s3564_s26, 1280  ;;  %s3383_s9 = smov [#allocation2]  }
  0x57   : > { %p3277_p9 = scmp.ne.s32.totalorder %s3564_s26, %s3276_s4  ;;  %s3281_s28 = sshll.u32 %s3383_s9, 4  ;;  %s3282_s28 = int_to_ptr.vmem [resolvable:$false] %s3281_s28 }
  0x58   : > { %s3283_s29 = scalar_lea.vmem %s3282_s28, 2560  ;;  %p3284_p7 = scmp.lt.s32.totalorder %s3564_s26, %s3282_s28 }
  0x59   : > { %p3279_p2 = pnand %p3277_p9, %p3263_p12  ;;  %p3285_p4 = scmp.lt.s32.totalorder %s3283_s29, %s3276_s4 }
  0x5b   : > { %p3280_p0 = pneg %p3279_p2  ;;  %p3286_p13 = por %p3285_p4, %p3284_p7 }
  0x5d   : > { %p3287_p6 = pnand %p3286_p13, %p3280_p0 }
  0x5f   : > { %3290 = shalt.err (!%p3287_p6)
}
  0x60   : > { %3056 = dma.hbm_to_vmem [thread:$0]  (!%p3551_p11), %s3562_s10, 1280, %s3564_s26, %s3566_s19, %s3381_s11, %s3381_s11, %s3382_s18  }
  0x61   : > { %207 = sbr.rel (%p3461_p8) target bundleno = 512 (0x200), region = 32  ;;  %s3600_s30 = sand.u32 (!%p3461_p8), 1, %s3361_s13  }
  0x62   : > { %s3033_s7 = smul.u32 (!%p3461_p8), 80, %s3600_s30  ;;  %s210_s8 = scalar_lea.sflag (!%p3461_p8), [#allocation3], %s3600_s30 }
  0x63   : > { %p4018_p7 = scmp.ne.s32.totalorder (!%p3461_p8), %s4012_s22, 0 }
  0x64   : > { %s3604_s21 = scalar_lea.vmem (!%p3461_p8), [#allocation2], %s3033_s7 }
  0x68   : > { %3344 = dma.done.wait (%p4018_p7), %s210_s8, 1280  }
  0x69   : > { %3346 = vsyncadd (%p4018_p7), %s210_s8, 4294966016  ;;  %p4019_p11 = scmp.ne.s32.totalorder %s4010_s20, 0 }
  0x6b   : > { %3348 = dma.done.wait (%p4019_p11), [#allocation6], 9232  }
  0x6c   : > { %3350 = vsyncadd (%p4019_p11), [#allocation6], 4294958064  ;;  %v3121_v0 = vld [vmem:[#allocation5 + $0x40] sm:$0xff]   ;;  %v3123_v2 = vld [vmem:[#allocation5 + $0x48] sm:$0xff]   ;;  %vm277_vm0 = vsmask.f32 3328 }
  0x6d   : > { %v3122_v1 = vld [vmem:[#allocation5 + $0x100] sm:$0xff]   ;;  %2735 = vmatprep.subr.bf16.mxu1 %v3121_v0  ;;  %v3124_v3 = vld [vmem:[#allocation5 + $0x108] sm:$0xff]   ;;  %v3125_v4 = vld [vmem:[#allocation5 + $0x50] sm:$0xff]   ;;  %vm278_vm1 = vsmask.f32 7440  ;;  %vm699_vm3 = vcmask 1042432  }
  0x6e   : > { %2831 = vmatprep.subr.bf16.mxu0 %v3122_v1  ;;  %2736 = vmatpush3.bf16.msra.mxu1 %v3121_v0  ;;  %v3126_v5 = vld [vmem:[#allocation5 + $0x110] sm:$0xff]   ;;  %v3127_v6 = vld [vmem:[#allocation5 + $0x58] sm:$0xff]   ;;  %v3129_v8 = vld [vmem:[#allocation5 + $0x60] sm:$0xff]   ;;  %vm700_vm4 = vcmask 1046532   ;;  %s2400_s20 = sshll.u32 %s3600_s30, 5  ;;  %s2603_s24 = sshll.u32 %s3369_s15, 9 }
  0x6f   : > { %2832 = vmatpush3.bf16.msra.mxu0 %v3122_v1  ;;  %2737 = vmatprep.subr.bf16.mxu1 %v3123_v2  ;;  %v3128_v7 = vld [vmem:[#allocation5 + $0x118] sm:$0xff]   ;;  %v3130_v9 = vld [vmem:[#allocation5 + $0x120] sm:$0xff]   ;;  %v3131_v10 = vld [vmem:[#allocation5 + $0x68] sm:$0xff]   ;;  %s243_s22 = scalar_lea.vmem [#allocation8], %s2400_s20  ;;  %s3951_s26 = scalar_lea.hbm %s4005_s3, %s2603_s24 }
  0x70   : > { %2833 = vmatprep.subr.bf16.mxu0 %v3124_v3  ;;  %v3132_v11 = vld [vmem:[#allocation5 + $0x128] sm:$0xff]   ;;  %v3615_v12 = vld [vmem:[%s3604_s21] sm:$0xf]  ;;  %v3621_v14 = vld [vmem:[%s3604_s21 + $0x4] sm:$0x1]  ;;  %s2284_s11 = sshll.u32 %s243_s22, 4  ;;  %s3953_s11 = int_to_ptr.vmem [resolvable:$true] %s2284_s11 }
  0x71   : > { %v3618_v13 = vld [vmem:[%s3604_s21 + $0x8] sm:$0xf]  ;;  %v3624_v15 = vld [vmem:[%s3604_s21 + $0xc] sm:$0x1]  ;;  %v281_v16 = vshrl.u32 %v3615_v12, 16  ;;  %v284_v17 = vshll.u32 %v3615_v12, 16  ;;  %vm3642_vm2 = vmor %vm277_vm0, %vm278_vm1 }
  0x72   : > { %2738 = vmatpush3.bf16.msra.mxu1 %v3123_v2  ;;  %v290_v18 = vshll.u32 %v3621_v14, 16  ;;  %v295_v19 = vshrl.u32 %v3618_v13, 16  ;;  %v298_v20 = vshll.u32 %v3618_v13, 16  ;;  %v304_v21 = vshll.u32 %v3624_v15, 16  ;;  %v3133_v22 = vld [vmem:[#allocation5 + $0x70] sm:$0xff]   ;;  %v3135_v44 = vld [vmem:[#allocation5 + $0x78] sm:$0xff]   ;;  %vm3768_vm5 = vmor %vm699_vm3, %vm700_vm4 }
  0x73   : > { %2834 = vmatpush3.bf16.msra.mxu0 %v3124_v3  ;;  %2739 = vmatprep.subr.bf16.mxu1 %v3125_v4  ;;  %v283_v23 = vrot.slane %v281_v16, 4  ;;  %v286_v24 = vrot.slane %v284_v17, 5  ;;  %v3134_v26 = vld [vmem:[#allocation5 + $0x130] sm:$0xff]   ;;  %v2465_v30 = vld [vmem:[%s3604_s21 + $0x8] sm:$0xf]  ;;  %v3137_v61 = vld [vmem:[#allocation5] sm:$0xff]  }
  0x74   : > { %2835 = vmatprep.subr.bf16.mxu0 %v3126_v5  ;;  %v297_v25 = vrot.slane %v295_v19, 4  ;;  %v292_v27 = vrot.slane %v290_v18, 5  ;;  %v300_v28 = vrot.slane %v298_v20, 5  ;;  %v306_v29 = vrot.slane %v304_v21, 5  ;;  %v3634_v32 = vld [vmem:[%s3604_s21 + $0xc] sm:$0x1] }
  0x75   : > { %v287_v31 = vor.u32 %v286_v24, %v283_v23  ;;  %v2467_v33 = vld [vmem:[%s3604_s21 + $0x10] sm:$0xf]  ;;  %v3638_v34 = vld [vmem:[%s3604_s21 + $0x14] sm:$0x1]  ;;  %v1076_v37 = vshrl.u32 %v2465_v30, 16  ;;  %v1079_v38 = vshll.u32 %v2465_v30, 16 }
  0x76   : > { %2740 = vmatpush3.bf16.msra.mxu1 %v3125_v4  ;;  %v301_v36 = vor.u32 %v300_v28, %v297_v25  ;;  %v1085_v39 = vshll.u32 %v3634_v32, 16  ;;  %v1090_v41 = vshrl.u32 %v2467_v33, 16  ;;  %v1093_v42 = vshll.u32 %v2467_v33, 16  ;;  %v3649_v48 = vld [vmem:[%s3604_s21 + $0x10] sm:$0xf]  ;;  %v3136_v49 = vld [vmem:[#allocation5 + $0x138] sm:$0xff]  }
  0x77   : > { %2836 = vmatpush3.bf16.msra.mxu0 %v3126_v5  ;;  %2741 = vmatprep.subr.bf16.mxu1 %v3127_v6  ;;  %v288_v40 = vrot.slane %v287_v31, 4  ;;  %v1099_v43 = vshll.u32 %v3638_v34, 16  ;;  %v1078_v46 = vrot.slane %v1076_v37, 4  ;;  %v1081_v47 = vrot.slane %v1079_v38, 5  ;;  %v3654_v53 = vld [vmem:[%s3604_s21 + $0x18] sm:$0xf] }
  0x78   : > { %2837 = vmatprep.subr.bf16.mxu0 %v3128_v7  ;;  %v302_v45 = vrot.slane %v301_v36, 4  ;;  %v1092_v51 = vrot.slane %v1090_v41, 4  ;;  %v1095_v52 = vrot.slane %v1093_v42, 5  ;;  %v1087_v56 = vrot.slane %v1085_v39, 5  ;;  %v3659_v58 = vld [vmem:[%s3604_s21 + $0x14] sm:$0x1] }
  0x79   : > { %v293_v50 = vsel %vm3642_vm2, %v288_v40, %v292_v27  ;;  %v1082_v55 = vor.u32 %v1081_v47, %v1078_v46  ;;  %v1101_v57 = vrot.slane %v1099_v43, 5  ;;  %v3662_v59 = vld [vmem:[%s3604_s21 + $0x1c] sm:$0x1]  ;;  %v3664_v63 = vld [vmem:[#allocation5 + $0x140] sm:$0xff]   ;;  %v309_v0 = vshrl.u32 %v3649_v48, 16  ;;  %s2270_s15 = scalar_lea.sflag [#allocation4], %s3600_s30 }
  0x7a   : > { %2742 = vmatpush3.bf16.msra.mxu1 %v3127_v6  ;;  %v307_v54 = vsel %vm3642_vm2, %v302_v45, %v306_v29  ;;  %v1096_v62 = vor.u32 %v1095_v52, %v1092_v51  ;;  %v312_v1 = vshll.u32 %v3649_v48, 16  ;;  %v2469_v2 = vld [vmem:[%s3604_s21 + $0x18] sm:$0xf]  ;;  %v318_v4 = vshll.u32 %v3659_v58, 16  ;;  %v2471_v16 = vld [vmem:[%s3604_s21 + $0x20] sm:$0xf] }
  0x7b   : > { %2838 = vmatpush3.bf16.msra.mxu0 %v3128_v7  ;;  %2743 = vmatprep.subr.bf16.mxu1 %v3129_v8  ;;  %v2401_v60 = vcombine.low %v293_v50, %v307_v54  ;;  %v1083_v3 = vrot.slane %v1082_v55, 4  ;;  %v323_v5 = vshrl.u32 %v3654_v53, 16  ;;  %v326_v6 = vshll.u32 %v3654_v53, 16  ;;  %v3673_v7 = vld [vmem:[%s3604_s21 + $0x1c] sm:$0x1]  ;;  %s3291_s10 = scalar_lea.vmem %s3953_s11, 512 }
  0x7c   : > { %2839 = vmatprep.subr.bf16.mxu0 %v3130_v9  ;;  %v3680_v20 = vld [vmem:[%s3604_s21 + $0x24] sm:$0x1]  ;;  %v320_v23 = vrot.slane %v318_v4, 5  ;;  %v1104_v27 = vshrl.u32 %v2469_v2, 16  ;;  %v1107_v29 = vshll.u32 %v2469_v2, 16  ;;  %v1113_v30 = vshll.u32 %v3673_v7, 16  ;;  %p3292_p8 = scmp.ne.s32.totalorder %s3953_s11, %s3291_s10 }
  0x7d   : > { %2751 = vmatprep.mubr.bf16.mxu1 %v2401_v60  ;;  %v1088_v17 = vsel %vm3642_vm2, %v1083_v3, %v1087_v56  ;;  %v325_v18 = vrot.slane %v323_v5, 4  ;;  %v328_v19 = vrot.slane %v326_v6, 5  ;;  %v1118_v31 = vshrl.u32 %v2471_v16, 16  ;;  %v3140_v55 = vld [vmem:[#allocation5 + $0x148] sm:$0xff]   ;;  %v3141_v56 = vld [vmem:[#allocation5 + $0x10] sm:$0xff]   ;;  %p4024_p12 = scmp.ne.s32.totalorder %s4016_s27, 0 }
  0x7e   : > { %2744 = vmatpush3.bf16.msra.mxu1 %v3129_v8  ;;  %v1097_v8 = vrot.slane %v1096_v62, 4  ;;  %v1106_v36 = vrot.slane %v1104_v27, 4  ;;  %v1121_v37 = vshll.u32 %v2471_v16, 16  ;;  %v1127_v38 = vshll.u32 %v3680_v20, 16  ;;  %v3707_v3 = vld [vmem:[%s3604_s21 + $0x2c] sm:$0x1] }
  0x7f   : > { %2840 = vmatpush3.bf16.msra.mxu0 %v3130_v9  ;;  %2745 = vmatprep.subr.bf16.mxu1 %v3131_v10  ;;  %v311_v9 = vrot.slane %v309_v0, 4  ;;  %v329_v25 = vor.u32 %v328_v19, %v325_v18  ;;  %v1109_v40 = vrot.slane %v1107_v29, 5  ;;  %v1120_v41 = vrot.slane %v1118_v31, 4  ;;  %v3698_v0 = vld [vmem:[%s3604_s21 + $0x20] sm:$0xf]  ;;  %v3143_v16 = vld [vmem:[#allocation5 + $0x18] sm:$0xff]   ;;  %p3293_p1 = pnand %p3292_p8, %p4024_p12 }
  0x80   : > { %2841 = vmatprep.subr.bf16.mxu0 %v3132_v11  ;;  %v1102_v21 = vsel %vm3642_vm2, %v1097_v8, %v1101_v57  ;;  %v1123_v43 = vrot.slane %v1121_v37, 5  ;;  %v1115_v47 = vrot.slane %v1113_v30, 5  ;;  %v1367_v57 = vrot.slane %v3634_v32, 5  ;;  %v2475_v27 = vld [vmem:[%s3604_s21 + $0x30] sm:$0xf]  ;;  %s3384_s19 = smov [#allocation8]  }
  0x81   : > { %v2481_v24 = vcombine.low %v1088_v17, %v1102_v21  ;;  %v330_v33 = vrot.slane %v329_v25, 4  ;;  %v1110_v46 = vor.u32 %v1109_v40, %v1106_v36  ;;  %v1371_v60 = vrot.slane %v3638_v34, 5  ;;  %v3145_v29 = vld [vmem:[#allocation5 + $0x20] sm:$0xff]   ;;  %v3144_v36 = vld [vmem:[#allocation5 + $0x158] sm:$0xff]   ;;  %p3294_p10 = pneg %p3293_p1  ;;  %s3295_s4 = sshll.u32 %s3384_s19, 4  ;;  %s3296_s4 = int_to_ptr.vmem [resolvable:$false] %s3295_s4 }
  0x82   : > { %2746 = vmatpush3.bf16.msra.mxu1 %v3131_v10  ;;  %v314_v10 = vrot.slane %v312_v1, 5  ;;  %v1124_v50 = vor.u32 %v1123_v43, %v1120_v41  ;;  %v3701_v1 = vld [vmem:[%s3604_s21 + $0x28] sm:$0xf]  ;;  %v337_v4 = vshrl.u32 %v3698_v0, 16  ;;  %v340_v5 = vshll.u32 %v3698_v0, 16  ;;  %s3297_s9 = scalar_lea.vmem %s3296_s4, 1024  ;;  %p3298_p3 = scmp.lt.s32.totalorder %s3953_s11, %s3296_s4 }
  0x83   : > { %2842 = vmatpush3.bf16.msra.mxu0 %v3132_v11  ;;  %2747 = vmatprep.subr.bf16.mxu1 %v3133_v22  ;;  %v332_v11 = vshll.u32 %v3662_v59, 16  ;;  %v1111_v51 = vrot.slane %v1110_v46, 4  ;;  %v351_v8 = vshrl.u32 %v3701_v1, 16  ;;  %v3147_v46 = vld [vmem:[#allocation5 + $0x28] sm:$0xff]   ;;  %v1379_v32 = vrot.slane %v3680_v20, 5  ;;  %p3299_p5 = scmp.lt.s32.totalorder %s3297_s9, %s3291_s10 }
  0x84   : > { %2843 = vmatprep.subr.bf16.mxu0 %v3134_v26  ;;  %2847 = vmatprep.mubr.bf16.mxu0 %v2481_v24  ;;  %v1125_v52 = vrot.slane %v1124_v50, 4  ;;  %v339_v17 = vrot.slane %v337_v4, 4  ;;  %v342_v18 = vrot.slane %v340_v5, 5  ;;  %v2473_v24 = vld [vmem:[%s3604_s21 + $0x28] sm:$0xf]  ;;  %v3146_v5 = vld [vmem:[#allocation5 + $0x160] sm:$0xff]  }
  0x85   : > { %v1116_v54 = vsel %vm3642_vm2, %v1111_v51, %v1115_v47  ;;  %v353_v21 = vrot.slane %v351_v8, 4  ;;  %v1132_v31 = vshrl.u32 %v2473_v24, 16  ;;  %p3300_p9 = por %p3299_p5, %p3298_p3 }
  0x86   : > { %2748 = vmatpush3.bf16.msra.mxu1 %v3133_v22  ;;  %v315_v22 = vor.u32 %v314_v10, %v311_v9  ;;  %v354_v9 = vshll.u32 %v3701_v1, 16  ;;  %v360_v10 = vshll.u32 %v3707_v3, 16  ;;  %v343_v25 = vor.u32 %v342_v18, %v339_v17  ;;  %v3748_v17 = vld [vmem:[%s3604_s21 + $0x3c] sm:$0x1] }
  0x87   : > { %2844 = vmatpush3.bf16.msra.mxu0 %v3134_v26  ;;  %2749 = vmatprep.subr.bf16.mxu1 %v3135_v44  ;;  %v334_v26 = vrot.slane %v332_v11, 5  ;;  %v3142_v11 = vld [vmem:[#allocation5 + $0x150] sm:$0xff]   ;;  %p3301_p2 = pnand %p3300_p9, %p3294_p10 }
  0x88   : > { %2845 = vmatprep.subr.bf16.mxu0 %v3136_v49  ;;  %v316_v28 = vrot.slane %v315_v22, 4  ;;  %v356_v22 = vrot.slane %v354_v9, 5  ;;  %v344_v37 = vrot.slane %v343_v25, 4 }
  0x89   : > { %v335_v42 = vsel %vm3642_vm2, %v330_v33, %v334_v26  ;;  %v3718_v26 = vld [vmem:[%s3604_s21 + $0x2c] sm:$0x1]  ;;  %v1135_v33 = vshll.u32 %v2473_v24, 16 }
  0x8a   : > { %2750 = vmatpush3.bf16.msra.mxu1 %v3135_v44  ;;  %v321_v39 = vsel %vm3642_vm2, %v316_v28, %v320_v23  ;;  %v3139_v44 = vld [vmem:[#allocation5 + $0x8] sm:$0xff]   ;;  %v362_v23 = vrot.slane %v360_v10, 5  ;;  %v3722_v28 = vld [vmem:[%s3604_s21 + $0x34] sm:$0x1]  ;;  %v357_v30 = vor.u32 %v356_v22, %v353_v21 }
  0x8b   : > { %2846 = vmatpush3.bf16.msra.mxu0 %v3136_v49  ;;  %2759 = vmatprep.subr.bf16.mxu1 %v3137_v61  ;;  %v2402_v45 = vcombine.low %v321_v39, %v335_v42  ;;  %v1129_v49 = vrot.slane %v1127_v38, 5  ;;  %v1146_v38 = vshrl.u32 %v2475_v27, 16  ;;  %v1149_v39 = vshll.u32 %v2475_v27, 16 }
  0x8c   : > { %2855 = vmatprep.subr.bf16.mxu0 %v3664_v63  ;;  %v1155_v40 = vshll.u32 %v3722_v28, 16  ;;  %v358_v41 = vrot.slane %v357_v30, 4  ;;  %v1134_v42 = vrot.slane %v1132_v31, 4  ;;  %v1137_v43 = vrot.slane %v1135_v33, 5  ;;  %v3754_v31 = vld [vmem:[%s3604_s21 + $0x44] sm:$0x1] }
  0x8d   : > { %2752 = vmatmul.mubr.bf16.vlgmr.msra.gmra.mrb[0].mxu1 %v2402_v45  ;;  %v1130_v62 = vsel %vm3642_vm2, %v1125_v52, %v1129_v49  ;;  %v3727_v45 = vld [vmem:[%s3604_s21 + $0x30] sm:$0xf]  ;;  %v1148_v49 = vrot.slane %v1146_v38, 4  ;;  %v1151_v50 = vrot.slane %v1149_v39, 5  ;;  %v3732_v52 = vld [vmem:[%s3604_s21 + $0x38] sm:$0xf] }
  0x8e   : > { %2760 = vmatpush3.bf16.msra.mxu1 %v3137_v61  ;;  %v2482_v2 = vcombine.low %v1116_v54, %v1130_v62  ;;  %v3704_v61 = vld [vmem:[%s3604_s21 + $0x24] sm:$0x1]  ;;  %v1157_v51 = vrot.slane %v1155_v40, 5  ;;  %v363_v54 = vsel %vm3642_vm2, %v358_v41, %v362_v23  ;;  %v3740_v62 = vld [vmem:[%s3604_s21 + $0x3c] sm:$0x1]  ;;  %v368_v4 = vshll.u32 %v3727_v45, 16 }
  0x8f   : > { %2761 = vmatprep.subr.bf16.mxu1 %v3139_v44  ;;  %v346_v6 = vshll.u32 %v3704_v61, 16  ;;  %v1152_v8 = vor.u32 %v1151_v50, %v1148_v49  ;;  %v379_v10 = vshrl.u32 %v3732_v52, 16  ;;  %v382_v22 = vshll.u32 %v3732_v52, 16  ;;  %v2479_v23 = vld [vmem:[%s3604_s21 + $0x40] sm:$0xf]  ;;  %v3148_v38 = vld [vmem:[#allocation5 + $0x168] sm:$0xff]  }
  0x90   : > { %2848 = vmatmul.mubr.bf16.vlgmr.msra.gmra.mrb[0].mxu0 %v2482_v2  ;;  %v365_v2 = vshrl.u32 %v3727_v45, 16  ;;  %v370_v21 = vrot.slane %v368_v4, 5  ;;  %v388_v30 = vshll.u32 %v3740_v62, 16  ;;  %v3149_v39 = vld [vmem:[#allocation5 + $0x30] sm:$0xff]  }
  0x91   : > { %2856 = vmatpush3.bf16.msra.mxu0 %v3664_v63  ;;  %v348_v19 = vrot.slane %v346_v6, 5  ;;  %v1141_v63 = vshll.u32 %v3718_v26, 16  ;;  %v1153_v24 = vrot.slane %v1152_v8, 4  ;;  %v381_v27 = vrot.slane %v379_v10, 4  ;;  %v2493_v8 = vld [vmem:[%s3604_s21 + $0x8] sm:$0xe] }
  0x92   : > { %2762 = vmatpush3.bf16.msra.mxu1 %v3139_v44  ;;  %2857 = vmatprep.subr.bf16.mxu0 %v3140_v55  ;;  %v390_v41 = vrot.slane %v388_v30, 5 }
  0x93   : > { %2763 = vmatprep.subr.bf16.mxu1 %v3141_v56  ;;  %v1143_v44 = vrot.slane %v1141_v63, 5  ;;  %v349_v47 = vsel %vm3642_vm2, %v344_v37, %v348_v19  ;;  %v367_v19 = vrot.slane %v365_v2, 4  ;;  %v384_v63 = vrot.slane %v382_v22, 5 }
  0x94   : > { %v2403_v6 = vcombine.low %v349_v47, %v363_v54  ;;  %v1158_v40 = vsel %vm3642_vm2, %v1153_v24, %v1157_v51  ;;  %v1177_v2 = vshll.u32 %v2479_v23, 16 }
  0x95   : > { %2858 = vmatpush3.bf16.msra.mxu0 %v3140_v55  ;;  %v1138_v55 = vor.u32 %v1137_v43, %v1134_v42  ;;  %v1169_v43 = vshll.u32 %v3748_v17, 16  ;;  %v385_v49 = vor.u32 %v384_v63, %v381_v27 }
  0x96   : > { %2764 = vmatpush3.bf16.msra.mxu1 %v3141_v56  ;;  %2859 = vmatprep.subr.bf16.mxu0 %v3142_v11  ;;  %v3737_v56 = vld [vmem:[%s3604_s21 + $0x34] sm:$0x1] }
  0x97   : > { %2765 = vmatprep.subr.bf16.mxu1 %v3143_v16  ;;  %v374_v9 = vshll.u32 %v3737_v56, 16  ;;  %v1139_v18 = vrot.slane %v1138_v55, 4  ;;  %2755 = vmatprep.mubr.bf16.mxu1 %v2403_v6  ;;  %v1171_v54 = vrot.slane %v1169_v43, 5  ;;  %v1174_v55 = vshrl.u32 %v2479_v23, 16  ;;  %v3152_v43 = vld [vmem:[#allocation5 + $0x178] sm:$0xff]  }
  0x98   : > { %v386_v4 = vrot.slane %v385_v49, 4  ;;  %v1183_v6 = vshll.u32 %v3754_v31, 16  ;;  %v2413_v23 = vcombine.low %v3615_v12, %v3618_v13  ;;  %v3155_v49 = vld [vmem:[#allocation5 + $0x180] sm:$0xff]  }
  0x99   : > { %2860 = vmatpush3.bf16.msra.mxu0 %v3142_v11  ;;  %v376_v25 = vrot.slane %v374_v9, 5  ;;  %v1144_v33 = vsel %vm3642_vm2, %v1139_v18, %v1143_v44  ;;  %v371_v11 = vor.u32 %v370_v21, %v367_v19  ;;  %v1176_v10 = vrot.slane %v1174_v55, 4  ;;  %v3151_v18 = vld [vmem:[#allocation5 + $0x38] sm:$0xff]   ;;  %v3150_v21 = vld [vmem:[#allocation5 + $0x170] sm:$0xff]  }
  0x9a   : > { %2766 = vmatpush3.bf16.msra.mxu1 %v3143_v16  ;;  %v2477_v16 = vld [vmem:[%s3604_s21 + $0x38] sm:$0xf]  ;;  %2861 = vmatprep.subr.bf16.mxu0 %v3144_v36  ;;  %v391_v22 = vsel %vm3642_vm2, %v386_v4, %v390_v41  ;;  %v2498_v55 = vld [vmem:[%s3604_s21 + $0x30] sm:$0xe] }
  0x9b   : > { %2767 = vmatprep.subr.bf16.mxu1 %v3145_v29  ;;  %v1160_v37 = vshrl.u32 %v2477_v16, 16  ;;  %v1163_v42 = vshll.u32 %v2477_v16, 16  ;;  %v372_v47 = vrot.slane %v371_v11, 4  ;;  %v1179_v16 = vrot.slane %v1177_v2, 5  ;;  %v2495_v11 = vld [vmem:[%s3604_s21 + $0x18] sm:$0xe] }
  0x9c   : > { %v2499_v4 = vld [vmem:[%s3604_s21 + $0x38] sm:$0xe] }
  0x9d   : > { %2862 = vmatpush3.bf16.msra.mxu0 %v3144_v36  ;;  %v1162_v44 = vrot.slane %v1160_v37, 4  ;;  %v1165_v50 = vrot.slane %v1163_v42, 5  ;;  %v377_v51 = vsel %vm3642_vm2, %v372_v47, %v376_v25  ;;  %v2494_v36 = vld [vmem:[%s3604_s21 + $0x10] sm:$0xe]  ;;  %v1180_v30 = vor.u32 %v1179_v16, %v1176_v10  ;;  %v2496_v37 = vld [vmem:[%s3604_s21 + $0x20] sm:$0xe] }
  0x9e   : > { %2768 = vmatpush3.bf16.msra.mxu1 %v3145_v29  ;;  %v2483_v29 = vcombine.low %v1144_v33, %v1158_v40  ;;  %2863 = vmatprep.subr.bf16.mxu0 %v3146_v5  ;;  %v2502_v24 = vrot.slane %v2494_v36, 9  ;;  %v2404_v25 = vcombine.low %v377_v51, %v391_v22  ;;  %v1185_v33 = vrot.slane %v1183_v6, 5  ;;  %v3154_v40 = vld [vmem:[#allocation5 + $0x80] sm:$0xff]   ;;  %v3157_v47 = vld [vmem:[#allocation5 + $0x88] sm:$0xff]   ;;  %v3161_v10 = vld [vmem:[#allocation5 + $0x98] sm:$0xff]  }
  0x9f   : > { %2769 = vmatprep.subr.bf16.mxu1 %v3147_v46  ;;  %v1166_v9 = vor.u32 %v1165_v50, %v1162_v44  ;;  %v1181_v13 = vrot.slane %v1180_v30, 4  ;;  %v2504_v41 = vrot.slane %v2496_v37, 9  ;;  %v704_v44 = vrot.slane %v3621_v14, 5  ;;  %v2497_v50 = vld [vmem:[%s3604_s21 + $0x28] sm:$0xe] }
  0xa0   : > { %2851 = vmatprep.mubr.bf16.mxu0 %v2483_v29  ;;  %v1372_v63 = vsel %vm3768_vm5, %v2502_v24, %v1371_v60  ;;  %2756 = vmatmul.mubr.bf16.gmra.mrb[4].mxu1 %v2404_v25  ;;  %v2503_v60 = vrot.slane %v2495_v11, 9  ;;  %v2414_v29 = vcombine.low %v3649_v48, %v3654_v53  ;;  %v1383_v48 = vrot.slane %v3718_v26, 5  ;;  %v2500_v36 = vld [vmem:[%s3604_s21 + $0x40] sm:$0xe]  ;;  %v3162_v25 = vld [vmem:[#allocation5 + $0x198] sm:$0xff]  }
  0xa1   : > { %2864 = vmatpush3.bf16.msra.mxu0 %v3146_v5  ;;  %v1167_v27 = vrot.slane %v1166_v9, 4  ;;  %2775 = vmatprep.mubr.bf16.mxu1 %v2413_v23  ;;  %v1186_v34 = vsel %vm3642_vm2, %v1181_v13, %v1185_v33  ;;  %v2505_v2 = vrot.slane %v2497_v50, 9  ;;  %v1391_v51 = vrot.slane %v3748_v17, 5  ;;  %v3160_v17 = vld [vmem:[#allocation5 + $0x190] sm:$0xff]   ;;  %v3175_v50 = vld [vmem:[#allocation5 + $0x1c0] sm:$0xff]  }
  0xa2   : > { %2770 = vmatpush3.bf16.msra.mxu1 %v3147_v46  ;;  %v2501_v46 = vrot.slane %v2493_v8, 9  ;;  %2865 = vmatprep.subr.bf16.mxu0 %v3148_v38  ;;  %v2506_v14 = vrot.slane %v2498_v55, 9  ;;  %v1395_v26 = vrot.slane %v3754_v31, 5  ;;  %v708_v6 = vrot.slane %v3624_v15, 5  ;;  %v3174_v37 = vld [vmem:[%s3604_s21 + $0x10] ss:$8 sps:$4 sm:$0xff]  }
  0xa3   : > { %2771 = vmatprep.subr.bf16.mxu1 %v3149_v39  ;;  %v1172_v12 = vsel %vm3642_vm2, %v1167_v27, %v1171_v54  ;;  %v1387_v54 = vrot.slane %v3722_v28, 5  ;;  %v1384_v8 = vsel %vm3768_vm5, %v2505_v2, %v1383_v48  ;;  %v2416_v28 = vcombine.low %v3727_v45, %v3732_v52  ;;  %v3163_v27 = vld [vmem:[#allocation5 + $0xa0] sm:$0xff]  }
  0xa4   : > { %v1368_v5 = vsel %vm3768_vm5, %v2501_v46, %v1367_v57  ;;  %v2484_v42 = vcombine.low %v1172_v12, %v1186_v34  ;;  %v2507_v9 = vrot.slane %v2499_v4, 9  ;;  %v2508_v31 = vrot.slane %v2500_v36, 9  ;;  %v675_v46 = vld [vmem:[%s3604_s21] sm:$0xe]  ;;  %v681_v48 = vld [vmem:[%s3604_s21 + $0x30] sm:$0xe] }
  0xa5   : > { %2866 = vmatpush3.bf16.msra.mxu0 %v3148_v38  ;;  %v2509_v57 = vcombine.low %v1368_v5, %v1372_v63  ;;  %v1380_v38 = vsel %vm3768_vm5, %v2504_v41, %v1379_v32  ;;  %v1388_v16 = vsel %vm3768_vm5, %v2506_v14, %v1387_v54  ;;  %v2425_v52 = vrot.slane %v675_v46, 9  ;;  %v677_v63 = vld [vmem:[%s3604_s21 + $0x10] sm:$0xe]  ;;  %v3849_v4 = vld [vmem:[%s3604_s21 + $0x14] sm:$0x1] }
  0xa6   : > { %2772 = vmatpush3.bf16.msra.mxu1 %v3149_v39  ;;  %v1375_v39 = vrot.slane %v3673_v7, 5  ;;  %2867 = vmatprep.subr.bf16.mxu0 %v3150_v21  ;;  %v2415_v7 = vcombine.low %v3698_v0, %v3701_v1  ;;  %v3158_v0 = vld [vmem:[#allocation5 + $0x188] sm:$0xff]   ;;  %v3159_v1 = vld [vmem:[#allocation5 + $0x90] sm:$0xff]   ;;  %v2511_v15 = vcombine.low %v1384_v8, %v1388_v16  ;;  %v1396_v45 = vsel %vm3768_vm5, %v2508_v31, %v1395_v26  ;;  %v3164_v34 = vld [vmem:[#allocation5 + $0x1a0] sm:$0xff]  }
  0xa7   : > { %2773 = vmatprep.subr.bf16.mxu1 %v3151_v18  ;;  %2852 = vmatmul.mubr.bf16.gmra.mrb[4].mxu0 %v2484_v42  ;;  %v712_v23 = vrot.slane %v3659_v58, 5  ;;  %v716_v24 = vrot.slane %v3662_v59, 5  ;;  %v705_v33 = vsel %vm3768_vm5, %v2425_v52, %v704_v44  ;;  %v678_v58 = vld [vmem:[%s3604_s21 + $0x18] sm:$0xe]  ;;  %v2427_v12 = vrot.slane %v677_v63, 9  ;;  %v3173_v44 = vld [vmem:[#allocation5 + $0xc0] sm:$0xff]  }
  0xa8   : > { %2871 = vmatprep.mubr.bf16.mxu0 %v2509_v57  ;;  %v1376_v20 = vsel %vm3768_vm5, %v2503_v60, %v1375_v39  ;;  %v2428_v13 = vrot.slane %v678_v58, 9  ;;  %v3165_v39 = vld [vmem:[#allocation5 + $0xa8] sm:$0xff]   ;;  %v3168_v57 = vld [vmem:[#allocation5 + $0xb0] sm:$0xff]   ;;  %v720_v41 = vrot.slane %v3704_v61, 5  ;;  %v3171_v42 = vld [vmem:[#allocation5 + $0xb8] sm:$0xff]   ;;  %v2431_v55 = vrot.slane %v681_v48, 9 }
  0xa9   : > { %2868 = vmatpush3.bf16.msra.mxu0 %v3150_v21  ;;  %v2510_v53 = vcombine.low %v1376_v20, %v1380_v38  ;;  %v676_v21 = vld [vmem:[%s3604_s21 + $0x8] sm:$0xe]  ;;  %v713_v59 = vsel %vm3768_vm5, %v2427_v12, %v712_v23  ;;  %v3169_v20 = vld [vmem:[#allocation5 + $0x1b0] sm:$0xff]   ;;  %v2543_v26 = vld [vmem:[%s3604_s21 + $0x18] sm:$0xf] }
  0xaa   : > { %2774 = vmatpush3.bf16.msra.mxu1 %v3151_v18  ;;  %2869 = vmatprep.subr.bf16.mxu0 %v3152_v43  ;;  %v1392_v18 = vsel %vm3768_vm5, %v2507_v9, %v1391_v51  ;;  %v2426_v22 = vrot.slane %v676_v21, 9  ;;  %v3166_v60 = vld [vmem:[#allocation5 + $0x1a8] sm:$0xff]   ;;  %v2541_v14 = vld [vmem:[%s3604_s21 + $0x10] sm:$0xf] }
  0xab   : > { %2783 = vmatprep.subr.bf16.mxu1 %v3154_v40  ;;  %v2512_v30 = vcombine.low %v1392_v18, %v1396_v45  ;;  %v3177_v51 = vld [vmem:[#allocation5 + $0xc8] sm:$0xff]   ;;  %v1742_v8 = vshll.u32 %v2541_v14, 16  ;;  %v3179_v31 = vld [vmem:[#allocation5 + $0xd0] sm:$0xff]  }
  0xac   : > { %v709_v11 = vsel %vm3768_vm5, %v2426_v22, %v708_v6  ;;  %v3853_v6 = vld [vmem:[%s3604_s21 + $0x1c] sm:$0x1]  ;;  %v3176_v36 = vld [vmem:[%s3604_s21 + $0x20] ss:$8 sps:$4 sm:$0xff]   ;;  %v3187_v45 = vld [vmem:[%s3604_s21 + $0x30] ss:$8 sps:$4 sm:$0xff]  }
  0xad   : > { %2776 = vmatmul.mubr.bf16.vlgmr.msra.gmra.mrb[0].mxu1 %v2414_v29  ;;  %2870 = vmatpush3.bf16.msra.mxu0 %v3152_v43  ;;  %v2433_v5 = vcombine.low %v705_v33, %v709_v11  ;;  %v724_v43 = vrot.slane %v3707_v3, 5  ;;  %v679_v29 = vld [vmem:[%s3604_s21 + $0x20] sm:$0xe]  ;;  %v1762_v16 = vshll.u32 %v3853_v6, 16  ;;  %v1744_v18 = vrot.slane %v1742_v8, 5  ;;  %v3178_v21 = vld [vmem:[#allocation5 + $0x1c8] sm:$0xff]  }
  0xae   : > { %2784 = vmatpush3.bf16.msra.mxu1 %v3154_v40  ;;  %2779 = vmatprep.mubr.bf16.mxu1 %v2415_v7  ;;  %v717_v40 = vsel %vm3768_vm5, %v2428_v13, %v716_v24  ;;  %v680_v7 = vld [vmem:[%s3604_s21 + $0x28] sm:$0xe]  ;;  %v2429_v38 = vrot.slane %v679_v29, 9  ;;  %v3180_v63 = vld [vmem:[#allocation5 + $0x1d0] sm:$0xff]   ;;  %v3877_v48 = vld [vmem:[%s3604_s21 + $0x2c] sm:$0x1] }
  0xaf   : > { %2785 = vmatprep.subr.bf16.mxu1 %v3157_v47  ;;  %2879 = vmatprep.subr.bf16.mxu0 %v3155_v49  ;;  %v2434_v32 = vcombine.low %v713_v59, %v717_v40  ;;  %v3181_v33 = vld [vmem:[#allocation5 + $0xd8] sm:$0xff]   ;;  %v2549_v40 = vld [vmem:[%s3604_s21 + $0x30] sm:$0xf] }
  0xb0   : > { %2872 = vmatmul.mubr.bf16.vlgmr.msra.gmra.mrb[0].mxu0 %v2510_v53  ;;  %v721_v61 = vsel %vm3768_vm5, %v2429_v38, %v720_v41  ;;  %v682_v53 = vld [vmem:[%s3604_s21 + $0x38] sm:$0xe]  ;;  %v3189_v13 = vld [vmem:[%s3604_s21 + $0x40] ss:$8 sps:$4 sm:$0xff]   ;;  %v1795_v29 = vshrl.u32 %v2549_v40, 16 }
  0xb1   : > { %2880 = vmatpush3.bf16.msra.mxu0 %v3155_v49  ;;  %2875 = vmatprep.mubr.bf16.mxu0 %v2511_v15  ;;  %v3172_v49 = vld [vmem:[#allocation5 + $0x1b8] sm:$0xff]   ;;  %v2432_v2 = vrot.slane %v682_v53, 9 }
  0xb2   : > { %2786 = vmatpush3.bf16.msra.mxu1 %v3157_v47  ;;  %2881 = vmatprep.subr.bf16.mxu0 %v3158_v0  ;;  %v2430_v47 = vrot.slane %v680_v7, 9  ;;  %v1798_v7 = vshll.u32 %v2549_v40, 16  ;;  %v3192_v40 = vld [vmem:[#allocation5 + $0x1f8] sm:$0xff]  }
  0xb3   : > { %2787 = vmatprep.subr.bf16.mxu1 %v3159_v1 }
  0xb4   : > { %v725_v3 = vsel %vm3768_vm5, %v2430_v47, %v724_v43 }
  0xb5   : > { %2780 = vmatmul.mubr.bf16.gmra.mrb[4].mxu1 %v2416_v28  ;;  %2882 = vmatpush3.bf16.msra.mxu0 %v3158_v0  ;;  %v728_v0 = vrot.slane %v3737_v56, 5  ;;  %v2435_v54 = vcombine.low %v721_v61, %v725_v3  ;;  %v1739_v56 = vshrl.u32 %v2541_v14, 16  ;;  %v1753_v28 = vshrl.u32 %v2543_v26, 16 }
  0xb6   : > { %2788 = vmatpush3.bf16.msra.mxu1 %v3159_v1  ;;  %2883 = vmatprep.subr.bf16.mxu0 %v3160_v17  ;;  %v732_v1 = vrot.slane %v3740_v62, 5  ;;  %v1748_v62 = vshll.u32 %v3849_v4, 16 }
  0xb7   : > { %2789 = vmatprep.subr.bf16.mxu1 %v3161_v10  ;;  %2799 = vmatprep.mubr.bf16.mxu1 %v2433_v5  ;;  %v729_v9 = vsel %vm3768_vm5, %v2431_v55, %v728_v0  ;;  %v1741_v15 = vrot.slane %v1739_v56, 4  ;;  %v1755_v46 = vrot.slane %v1753_v28, 4  ;;  %v2545_v5 = vld [vmem:[%s3604_s21 + $0x20] sm:$0xf]  ;;  %v1797_v55 = vrot.slane %v1795_v29, 4 }
  0xb8   : > { %2876 = vmatmul.mubr.bf16.gmra.mrb[4].mxu0 %v2512_v30  ;;  %v1750_v24 = vrot.slane %v1748_v62, 5  ;;  %v1764_v30 = vrot.slane %v1762_v16, 5  ;;  %v1770_v41 = vshll.u32 %v2545_v5, 16  ;;  %v2553_v56 = vld [vmem:[%s3604_s21 + $0x40] sm:$0xf]  ;;  %v1790_v62 = vshll.u32 %v3877_v48, 16 }
  0xb9   : > { %2884 = vmatpush3.bf16.msra.mxu0 %v3160_v17  ;;  %2895 = vmatprep.mubr.bf16.mxu0 %v3174_v37  ;;  %v733_v17 = vsel %vm3768_vm5, %v2432_v2, %v732_v1  ;;  %v1745_v23 = vor.u32 %v1744_v18, %v1741_v15  ;;  %v2547_v37 = vld [vmem:[%s3604_s21 + $0x28] sm:$0xf]  ;;  %v3880_v1 = vld [vmem:[%s3604_s21 + $0x34] sm:$0x1]  ;;  %v1800_v2 = vrot.slane %v1798_v7, 5  ;;  %v1826_v15 = vshll.u32 %v2553_v56, 16 }
  0xba   : > { %2790 = vmatpush3.bf16.msra.mxu1 %v3161_v10  ;;  %2885 = vmatprep.subr.bf16.mxu0 %v3162_v25  ;;  %v1756_v10 = vshll.u32 %v2543_v26, 16  ;;  %v2436_v22 = vcombine.low %v729_v9, %v733_v17  ;;  %v1784_v43 = vshll.u32 %v2547_v37, 16  ;;  %v1772_v3 = vrot.slane %v1770_v41, 5  ;;  %v2555_v28 = vld [vmem:[%s3604_s21 + $0x48] sm:$0xf]  ;;  %v3190_v18 = vld [vmem:[#allocation5 + $0x1f0] sm:$0xff]  }
  0xbb   : > { %2791 = vmatprep.subr.bf16.mxu1 %v3163_v27  ;;  %v1746_v11 = vrot.slane %v1745_v23, 4  ;;  %v1804_v17 = vshll.u32 %v3880_v1, 16  ;;  %v1801_v16 = vor.u32 %v1800_v2, %v1797_v55 }
  0xbc   : > { %v1758_v52 = vrot.slane %v1756_v10, 5  ;;  %v1786_v0 = vrot.slane %v1784_v43, 5  ;;  %v3197_v43 = vld [vmem:[%s3604_s21 + $0x28] ss:$8 sps:$4 sm:$0xff]  }
  0xbd   : > { %2886 = vmatpush3.bf16.msra.mxu0 %v3162_v25  ;;  %v3193_v25 = vld [vmem:[%s3604_s21 + $0x8] ss:$8 sps:$4 sm:$0xff]   ;;  %v1751_v12 = vsel %vm3642_vm2, %v1746_v11, %v1750_v24  ;;  %v3892_v11 = vld [vmem:[%s3604_s21 + $0x44] sm:$0x1] }
  0xbe   : > { %2792 = vmatpush3.bf16.msra.mxu1 %v3163_v27  ;;  %2887 = vmatprep.subr.bf16.mxu0 %v3164_v34  ;;  %v1759_v27 = vor.u32 %v1758_v52, %v1755_v46  ;;  %v3191_v52 = vld [vmem:[#allocation5 + $0xf8] sm:$0xff]   ;;  %v1832_v41 = vshll.u32 %v3892_v11, 16 }
  0xbf   : > { %2793 = vmatprep.subr.bf16.mxu1 %v3165_v39 }
  0xc0   : > { %v1760_v58 = vrot.slane %v1759_v27, 4  ;;  %v1802_v27 = vrot.slane %v1801_v16, 4  ;;  %v1834_v55 = vrot.slane %v1832_v41, 5 }
  0xc1   : > { %2888 = vmatpush3.bf16.msra.mxu0 %v3164_v34  ;;  %v2551_v34 = vld [vmem:[%s3604_s21 + $0x38] sm:$0xf] }
  0xc2   : > { %2794 = vmatpush3.bf16.msra.mxu1 %v3165_v39  ;;  %2889 = vmatprep.subr.bf16.mxu0 %v3166_v60  ;;  %v1765_v59 = vsel %vm3642_vm2, %v1760_v58, %v1764_v30  ;;  %v3183_v39 = vld [vmem:[#allocation5 + $0xe0] sm:$0xff]   ;;  %v1809_v38 = vshrl.u32 %v2551_v34, 16  ;;  %v1812_v47 = vshll.u32 %v2551_v34, 16  ;;  %v1806_v30 = vrot.slane %v1804_v17, 5  ;;  %v3895_v58 = vld [vmem:[%s3604_s21 + $0x4c] sm:$0x1] }
  0xc3   : > { %2795 = vmatprep.subr.bf16.mxu1 %v3168_v57  ;;  %v3194_v34 = vld [vmem:[%s3604_s21 + $0x18] ss:$8 sps:$4 sm:$0xff]   ;;  %v2034_v17 = vrot.slane %v3853_v6, 5 }
  0xc4   : > { %v1811_v14 = vrot.slane %v1809_v38, 4  ;;  %v1814_v26 = vrot.slane %v1812_v47, 5  ;;  %v1807_v29 = vsel %vm3642_vm2, %v1802_v27, %v1806_v30  ;;  %v3196_v47 = vld [vmem:[#allocation5 + $0x208] sm:$0xff]   ;;  %v3204_v30 = vld [vmem:[#allocation5 + $0x238] sm:$0xff]  }
  0xc5   : > { %2890 = vmatpush3.bf16.msra.mxu0 %v3166_v60  ;;  %v2557_v60 = vcombine.low %v1751_v12, %v1765_v59  ;;  %v3195_v59 = vld [vmem:[#allocation5 + $0x200] sm:$0xff]  }
  0xc6   : > { %2796 = vmatpush3.bf16.msra.mxu1 %v3168_v57  ;;  %2891 = vmatprep.subr.bf16.mxu0 %v3169_v20  ;;  %v3182_v57 = vld [vmem:[#allocation5 + $0x1d8] sm:$0xff]   ;;  %v1815_v46 = vor.u32 %v1814_v26, %v1811_v14 }
  0xc7   : > { %2797 = vmatprep.subr.bf16.mxu1 %v3171_v42  ;;  %v2570_v14 = vld [vmem:[%s3604_s21 + $0x18] sm:$0xe] }
  0xc9   : > { %2892 = vmatpush3.bf16.msra.mxu0 %v3169_v20  ;;  %v3184_v20 = vld [vmem:[#allocation5 + $0x1e0] sm:$0xff]  }
  0xca   : > { %2798 = vmatpush3.bf16.msra.mxu1 %v3171_v42  ;;  %2893 = vmatprep.subr.bf16.mxu0 %v3172_v49  ;;  %v1781_v42 = vshrl.u32 %v2547_v37, 16  ;;  %v1828_v37 = vrot.slane %v1826_v15, 5  ;;  %v3200_v15 = vld [vmem:[#allocation5 + $0x218] sm:$0xff]  }
  0xcb   : > { %2807 = vmatprep.subr.bf16.mxu1 %v3173_v44 }
  0xcc   : > { %v1783_v53 = vrot.slane %v1781_v42, 4  ;;  %v1846_v42 = vshll.u32 %v3895_v58, 16 }
  0xcd   : > { %2800 = vmatmul.mubr.bf16.vlgmr.msra.gmra.mrb[0].mxu1 %v2434_v32  ;;  %2894 = vmatpush3.bf16.msra.mxu0 %v3172_v49  ;;  %v1767_v32 = vshrl.u32 %v2545_v5, 16  ;;  %v3185_v49 = vld [vmem:[#allocation5 + $0xe8] sm:$0xff]  }
  0xce   : > { %2808 = vmatpush3.bf16.msra.mxu1 %v3173_v44  ;;  %2803 = vmatprep.mubr.bf16.mxu1 %v2435_v54  ;;  %v3874_v44 = vld [vmem:[%s3604_s21 + $0x24] sm:$0x1]  ;;  %v3883_v54 = vld [vmem:[%s3604_s21 + $0x3c] sm:$0x1]  ;;  %v1787_v9 = vor.u32 %v1786_v0, %v1783_v53  ;;  %v1848_v2 = vrot.slane %v1846_v42, 5 }
  0xcf   : > { %2809 = vmatprep.subr.bf16.mxu1 %v3177_v51  ;;  %2903 = vmatprep.subr.bf16.mxu0 %v3175_v50  ;;  %v1769_v61 = vrot.slane %v1767_v32, 4  ;;  %v1776_v8 = vshll.u32 %v3874_v44, 16  ;;  %v1818_v10 = vshll.u32 %v3883_v54, 16  ;;  %v2574_v32 = vld [vmem:[%s3604_s21 + $0x38] sm:$0xe]  ;;  %v2050_v53 = vrot.slane %v3883_v54, 5 }
  0xd0   : > { %2896 = vmatmul.mubr.bf16.vlgmr.msra.gmra.mrb[0].mxu0 %v3176_v36  ;;  %v1788_v24 = vrot.slane %v1787_v9, 4  ;;  %v2578_v9 = vrot.slane %v2570_v14, 9 }
  0xd1   : > { %2904 = vmatpush3.bf16.msra.mxu0 %v3175_v50  ;;  %2899 = vmatprep.mubr.bf16.mxu0 %v3187_v45  ;;  %v3188_v50 = vld [vmem:[#allocation5 + $0xf0] sm:$0xff]   ;;  %v1773_v36 = vor.u32 %v1772_v3, %v1769_v61  ;;  %v1840_v45 = vshll.u32 %v2555_v28, 16  ;;  %v1778_v23 = vrot.slane %v1776_v8, 5  ;;  %v2046_v61 = vrot.slane %v3880_v1, 5 }
  0xd2   : > { %2810 = vmatpush3.bf16.msra.mxu1 %v3177_v51  ;;  %2905 = vmatprep.subr.bf16.mxu0 %v3178_v21  ;;  %v3186_v51 = vld [vmem:[#allocation5 + $0x1e8] sm:$0xff]   ;;  %v2582_v3 = vrot.slane %v2574_v32, 9  ;;  %v3199_v8 = vld [vmem:[#allocation5 + $0x210] sm:$0xff]   ;;  %v2035_v6 = vsel %vm3768_vm5, %v2578_v9, %v2034_v17 }
  0xd3   : > { %2811 = vmatprep.subr.bf16.mxu1 %v3179_v31 }
  0xd4   : > { %v2051_v54 = vsel %vm3768_vm5, %v2582_v3, %v2050_v53  ;;  %v2597_v3 = vld [vmem:[#allocation7] ss:$0 sm:$0xff] }
  0xd5   : > { %2804 = vmatmul.mubr.bf16.gmra.mrb[4].mxu1 %v2436_v22  ;;  %2906 = vmatpush3.bf16.msra.mxu0 %v3178_v21  ;;  %v1837_v21 = vshrl.u32 %v2555_v28, 16  ;;  %v1774_v22 = vrot.slane %v1773_v36, 4  ;;  %v2030_v36 = vrot.slane %v3849_v4, 5 }
  0xd6   : > { %2812 = vmatpush3.bf16.msra.mxu1 %v3179_v31  ;;  %2823 = vmatprep.mubr.bf16.mxu1 %v3193_v25  ;;  %v1823_v31 = vshrl.u32 %v2553_v56, 16  ;;  %v1792_v25 = vrot.slane %v1790_v62, 5  ;;  %v3198_v62 = vld [vmem:[%s3604_s21 + $0x38] ss:$8 sps:$4 sm:$0xff]  }
  0xd7   : > { %2813 = vmatprep.subr.bf16.mxu1 %v3181_v33  ;;  %2907 = vmatprep.subr.bf16.mxu0 %v3180_v63  ;;  %v1839_v12 = vrot.slane %v1837_v21, 4  ;;  %v3202_v21 = vld [vmem:[#allocation5 + $0x228] sm:$0xff]  }
  0xd8   : > { %2900 = vmatmul.mubr.bf16.gmra.mrb[4].mxu0 %v3189_v13  ;;  %v1825_v5 = vrot.slane %v1823_v31, 4  ;;  %v1842_v13 = vrot.slane %v1840_v45, 5  ;;  %v3203_v45 = vld [vmem:[#allocation5 + $0x230] sm:$0xff]  }
  0xd9   : > { %2908 = vmatpush3.bf16.msra.mxu0 %v3180_v63  ;;  %2919 = vmatprep.mubr.bf16.mxu0 %v2557_v60  ;;  %v1816_v63 = vrot.slane %v1815_v46, 4  ;;  %v1793_v60 = vsel %vm3642_vm2, %v1788_v24, %v1792_v25  ;;  %v3201_v46 = vld [vmem:[#allocation5 + $0x220] sm:$0xff]   ;;  %v2058_v24 = vrot.slane %v3895_v58, 5  ;;  %v2038_v58 = vrot.slane %v3874_v44, 5 }
  0xda   : > { %2814 = vmatpush3.bf16.msra.mxu1 %v3181_v33  ;;  %2909 = vmatprep.subr.bf16.mxu0 %v3182_v57  ;;  %v1820_v33 = vrot.slane %v1818_v10, 5  ;;  %v1843_v38 = vor.u32 %v1842_v13, %v1839_v12  ;;  %v2042_v13 = vrot.slane %v3877_v48, 5 }
  0xdb   : > { %2815 = vmatprep.subr.bf16.mxu1 %v3183_v39 }
  0xdc   : > { %v1821_v7 = vsel %vm3642_vm2, %v1816_v63, %v1820_v33  ;;  %v1844_v56 = vrot.slane %v1843_v38, 4  ;;  %v2571_v33 = vld [vmem:[%s3604_s21 + $0x20] sm:$0xe] }
  0xdd   : > { %2910 = vmatpush3.bf16.msra.mxu0 %v3182_v57  ;;  %v1779_v57 = vsel %vm3642_vm2, %v1774_v22, %v1778_v23  ;;  %v2576_v22 = vld [vmem:[%s3604_s21 + $0x48] sm:$0xe]  ;;  %v2054_v23 = vrot.slane %v3892_v11, 5  ;;  %v2579_v11 = vrot.slane %v2571_v33, 9 }
  0xde   : > { %2816 = vmatpush3.bf16.msra.mxu1 %v3183_v39  ;;  %2911 = vmatprep.subr.bf16.mxu0 %v3184_v20  ;;  %v2573_v39 = vld [vmem:[%s3604_s21 + $0x30] sm:$0xe]  ;;  %v2558_v0 = vcombine.low %v1779_v57, %v1793_v60  ;;  %v1849_v31 = vsel %vm3642_vm2, %v1844_v56, %v1848_v2  ;;  %v2584_v27 = vrot.slane %v2576_v22, 9 }
  0xdf   : > { %2817 = vmatprep.subr.bf16.mxu1 %v3185_v49 }
  0xe1   : > { %2912 = vmatpush3.bf16.msra.mxu0 %v3184_v20  ;;  %v1829_v20 = vor.u32 %v1828_v37, %v1825_v5  ;;  %v2572_v5 = vld [vmem:[%s3604_s21 + $0x28] sm:$0xe]  ;;  %v2059_v37 = vsel %vm3768_vm5, %v2584_v27, %v2058_v24 }
  0xe2   : > { %2818 = vmatpush3.bf16.msra.mxu1 %v3185_v49  ;;  %2913 = vmatprep.subr.bf16.mxu0 %v3186_v51  ;;  %v2581_v49 = vrot.slane %v2573_v39, 9  ;;  %v2580_v12 = vrot.slane %v2572_v5, 9 }
  0xe3   : > { %2819 = vmatprep.subr.bf16.mxu1 %v3188_v50  ;;  %v1830_v26 = vrot.slane %v1829_v20, 4 }
  0xe4   : > { %v2047_v1 = vsel %vm3768_vm5, %v2581_v49, %v2046_v61  ;;  %v2043_v39 = vsel %vm3768_vm5, %v2580_v12, %v2042_v13 }
  0xe5   : > { %2914 = vmatpush3.bf16.msra.mxu0 %v3186_v51  ;;  %v2569_v51 = vld [vmem:[%s3604_s21 + $0x10] sm:$0xe]  ;;  %v2587_v10 = vcombine.low %v2047_v1, %v2051_v54  ;;  %v1835_v16 = vsel %vm3642_vm2, %v1830_v26, %v1834_v55 }
  0xe6   : > { %2820 = vmatpush3.bf16.msra.mxu1 %v3188_v50  ;;  %2915 = vmatprep.subr.bf16.mxu0 %v3190_v18  ;;  %v2559_v50 = vcombine.low %v1807_v29, %v1821_v7  ;;  %v2577_v28 = vrot.slane %v2569_v51, 9 }
  0xe7   : > { %2821 = vmatprep.subr.bf16.mxu1 %v3191_v52 }
  0xe8   : > { %v2031_v4 = vsel %vm3768_vm5, %v2577_v28, %v2030_v36 }
  0xe9   : > { %2916 = vmatpush3.bf16.msra.mxu0 %v3190_v18  ;;  %v2560_v18 = vcombine.low %v1835_v16, %v1849_v31  ;;  %v2585_v35 = vcombine.low %v2031_v4, %v2035_v6 }
  0xea   : > { %2822 = vmatpush3.bf16.msra.mxu1 %v3191_v52  ;;  %2917 = vmatprep.subr.bf16.mxu0 %v3192_v40  ;;  %v2575_v52 = vld [vmem:[%s3604_s21 + $0x40] sm:$0xe] }
  0xeb   : > { %2951 = vmatprep.subr.bf16.mxu1 %v3195_v59  ;;  %v2583_v25 = vrot.slane %v2575_v52, 9 }
  0xed   : > { %2824 = vmatmul.mubr.bf16.vlgmr.msra.gmra.mrb[0].mxu1 %v3194_v34  ;;  %2918 = vmatpush3.bf16.msra.mxu0 %v3192_v40  ;;  %v2055_v63 = vsel %vm3768_vm5, %v2583_v25, %v2054_v23  ;;  %v2039_v40 = vsel %vm3768_vm5, %v2579_v11, %v2038_v58 }
  0xee   : > { %2959 = vmatpush3.bf16.msra.mxu1 %v3195_v59  ;;  %2827 = vmatprep.mubr.bf16.mxu1 %v3197_v43  ;;  %v2586_v32 = vcombine.low %v2039_v40, %v2043_v39 }
  0xef   : > { %2952 = vmatprep.subr.bf16.mxu1 %v3196_v47  ;;  %2927 = vmatprep.subr.bf16.mxu0 %v3195_v59 }
  0xf0   : > { %2920 = vmatmul.mubr.bf16.vlgmr.msra.gmra.mrb[0].mxu0 %v2558_v0 }
  0xf1   : > { %2928 = vmatpush3.bf16.msra.mxu0 %v3195_v59  ;;  %2923 = vmatprep.mubr.bf16.mxu0 %v2559_v50  ;;  %v2588_v59 = vcombine.low %v2055_v63, %v2059_v37 }
  0xf2   : > { %2960 = vmatpush3.bf16.msra.mxu1 %v3196_v47  ;;  %2929 = vmatprep.subr.bf16.mxu0 %v3196_v47 }
  0xf3   : > { %2953 = vmatprep.subr.bf16.mxu1 %v3199_v8 }
  0xf5   : > { %2828 = vmatmul.mubr.bf16.gmra.mrb[4].mxu1 %v3198_v62  ;;  %2930 = vmatpush3.bf16.msra.mxu0 %v3196_v47 }
  0xf6   : > { %2961 = vmatpush3.bf16.msra.mxu1 %v3199_v8  ;;  %2947 = vmatprep.mubr.bf16.mxu1 %v2587_v10 }
  0xf7   : > { %2954 = vmatprep.subr.bf16.mxu1 %v3200_v15  ;;  %2931 = vmatprep.subr.bf16.mxu0 %v3199_v8 }
  0xf8   : > { %2924 = vmatmul.mubr.bf16.gmra.mrb[4].mxu0 %v2560_v18 }
  0xf9   : > { %2932 = vmatpush3.bf16.msra.mxu0 %v3199_v8  ;;  %2943 = vmatprep.mubr.bf16.mxu0 %v2585_v35 }
  0xfa   : > { %2962 = vmatpush3.bf16.msra.mxu1 %v3200_v15  ;;  %2933 = vmatprep.subr.bf16.mxu0 %v3200_v15 }
  0xfb   : > { %2955 = vmatprep.subr.bf16.mxu1 %v3201_v46 }
  0xfd   : > { %2934 = vmatpush3.bf16.msra.mxu0 %v3200_v15 }
  0xfe   : > { %2963 = vmatpush3.bf16.msra.mxu1 %v3201_v46  ;;  %2935 = vmatprep.subr.bf16.mxu0 %v3201_v46 }
  0xff   : > { %2956 = vmatprep.subr.bf16.mxu1 %v3202_v21 }
 0x101   : > { %2936 = vmatpush3.bf16.msra.mxu0 %v3201_v46 }
 0x102   : > { %2964 = vmatpush3.bf16.msra.mxu1 %v3202_v21  ;;  %2937 = vmatprep.subr.bf16.mxu0 %v3202_v21 }
 0x103   : > { %2957 = vmatprep.subr.bf16.mxu1 %v3203_v45 }
 0x105   : > { %2938 = vmatpush3.bf16.msra.mxu0 %v3202_v21 }
 0x106   : > { %2965 = vmatpush3.bf16.msra.mxu1 %v3203_v45  ;;  %2939 = vmatprep.subr.bf16.mxu0 %v3203_v45 }
 0x107   : > { %2958 = vmatprep.subr.bf16.mxu1 %v3204_v30 }
 0x109   : > { %2940 = vmatpush3.bf16.msra.mxu0 %v3203_v45 }
 0x10a   : > { %2966 = vmatpush3.bf16.msra.mxu1 %v3204_v30  ;;  %2941 = vmatprep.subr.bf16.mxu0 %v3204_v30 }
 0x10d   : > { %2948 = vmatmul.mubr.bf16.vlgmr.msra.gmra.mrb[8].mxu1 %v2588_v59  ;;  %2942 = vmatpush3.bf16.msra.mxu0 %v3204_v30 }
 0x110   : > { %2944 = vmatmul.mubr.bf16.vlgmr.msra.gmra.mrb[0].mxu0 %v2586_v32 }
 0x1c0   : > { %v2825_v34 = vpop.f32.mrb[0].mxu1 }
 0x1c1   : > { %v1020_v44 = vpop.f32.mrb[1].mxu1 }
 0x1c2   : > { %v2826_v57 = vpop.f32.mrb[2].mxu1 }
 0x1c3   : > { %v1023_v60 = vpop.f32.mrb[3].mxu1 }
 0x1c8   : > { %v2829_v48 = vpop.f32.mrb[4].mxu1 }
 0x1c9   : > { %v1036_v41 = vpop.f32.mrb[5].mxu1 }
 0x1ca   : > { %v2830_v42 = vpop.f32.mrb[6].mxu1 }
 0x1cb   : > { %v1039_v43 = vpop.f32.mrb[7].mxu1  ;;  %v2925_v29 = vpop.f32.mrb[4].mxu0 }
 0x1cc   : > { %v2971_v7 = vadd.f32 %v2925_v29, %v2829_v48  ;;  %v1981_v20 = vpop.f32.mrb[5].mxu0 }
 0x1cd   : > { %v2973_v38 = vadd.f32 %v1981_v20, %v1036_v41  ;;  %v2926_v47 = vpop.f32.mrb[6].mxu0 }
 0x1ce   : > { %v2975_v19 = vadd.f32 %v2926_v47, %v2830_v42  ;;  %v1984_v49 = vpop.f32.mrb[7].mxu0 }
 0x1cf   : > { %v2977_v61 = vadd.f32 %v1984_v49, %v1039_v43 }
 0x1e0   : > { %v2949_v53 = vpop.f32.mrb[8].mxu1 }
 0x1e1   : > { %v2972_v0 = vadd.f32 %v2971_v7, %v2949_v53  ;;  %v2191_v50 = vpop.f32.mrb[9].mxu1 }
 0x1e2   : > { %v2974_v55 = vadd.f32 %v2973_v38, %v2191_v50  ;;  %v2950_v2 = vpop.f32.mrb[10].mxu1 }
 0x1e3   : > { %v2227_v51 = vadd.f32 %v2972_v0, %v2597_v3  ;;  %v2976_v14 = vadd.f32 %v2975_v19, %v2950_v2  ;;  %v2194_v26 = vpop.f32.mrb[11].mxu1  ;;  %v2945_v54 = vpop.f32.mrb[0].mxu0 }
 0x1e4   : > { %v2225_v56 = vadd.f32 %v2974_v55, %v2597_v3  ;;  %v2978_v1 = vadd.f32 %v2977_v61, %v2194_v26  ;;  %v2967_v28 = vadd.f32 %v2945_v54, %v2825_v34  ;;  %v2175_v36 = vpop.f32.mrb[1].mxu0 }
 0x1e5   : > { %vm2235_vm6 = vcmp.ge.f32.partialorder %v2227_v51, 0.0  ;;  %v2243_v8 = vmul.f32 0.01, %v2227_v51  ;;  %v2228_v62 = vadd.f32 %v2976_v14, %v2597_v3  ;;  %v2968_v10 = vadd.f32 %v2175_v36, %v1020_v44  ;;  %v2946_v16 = vpop.f32.mrb[2].mxu0 }
 0x1e6   : > { %v2241_v9 = vmul.f32 0.01, %v2225_v56  ;;  %v2226_v17 = vadd.f32 %v2978_v1, %v2597_v3  ;;  %vm2233_vm7 = vcmp.ge.f32.partialorder %v2225_v56, 0.0  ;;  %v2223_v15 = vadd.f32 %v2967_v28, %v2597_v3  ;;  %v2178_v18 = vpop.f32.mrb[3].mxu0 }
 0x1e7   : > { %vm2236_vm8 = vcmp.ge.f32.partialorder %v2228_v62, 0.0  ;;  %v2244_v31 = vmul.f32 0.01, %v2228_v62  ;;  %v2251_v4 = vsel %vm2235_vm6, %v2227_v51, %v2243_v8  ;;  %v2969_v6 = vadd.f32 %v2946_v16, %v2826_v57 }
 0x1e8   : > { %vm2234_vm9 = vcmp.ge.f32.partialorder %v2226_v17, 0.0  ;;  %v2221_v46 = vadd.f32 %v2968_v10, %v2597_v3  ;;  %v2970_v21 = vadd.f32 %v2178_v18, %v1023_v60  ;;  %v2242_v45 = vmul.f32 0.01, %v2226_v17 }
 0x1e9   : > { %v2252_v35 = vsel %vm2236_vm8, %v2228_v62, %v2244_v31  ;;  %v2239_v52 = vmul.f32 0.01, %v2223_v15  ;;  %v2249_v22 = vsel %vm2233_vm7, %v2225_v56, %v2241_v9  ;;  %v2224_v23 = vadd.f32 %v2969_v6, %v2597_v3 }
 0x1ea   : > { %v2622_v24 = vpack.c.bf16 %v2252_v35, %v2251_v4  ;;  %vm2231_vm10 = vcmp.ge.f32.partialorder %v2223_v15, 0.0  ;;  %v2237_v25 = vmul.f32 0.01, %v2221_v46  ;;  %v2222_v27 = vadd.f32 %v2970_v21, %v2597_v3 }
 0x1eb   : > { %v2250_v30 = vsel %vm2234_vm9, %v2226_v17, %v2242_v45  ;;  %vm2229_vm11 = vcmp.ge.f32.partialorder %v2221_v46, 0.0  ;;  %vm2232_vm12 = vcmp.ge.f32.partialorder %v2224_v23, 0.0  ;;  %v2240_v33 = vmul.f32 0.01, %v2224_v23 }
 0x1ec   : > { %2626 = vst [vmem:[%s243_s22 + $0x18] sm:$0xff] %v2622_v24   ;;  %v2617_v5 = vpack.c.bf16 %v2250_v30, %v2249_v22  ;;  %vm2230_vm13 = vcmp.ge.f32.partialorder %v2222_v27, 0.0  ;;  %v2238_v63 = vmul.f32 0.01, %v2222_v27  ;;  %v2247_v37 = vsel %vm2231_vm10, %v2223_v15, %v2239_v52 }
 0x1ed   : > { %v2248_v11 = vsel %vm2232_vm12, %v2224_v23, %v2240_v33  ;;  %v2245_v58 = vsel %vm2229_vm11, %v2221_v46, %v2237_v25 }
 0x1ee   : > { %2625 = vst [vmem:[%s243_s22 + $0x10] sm:$0xff] %v2617_v5   ;;  %v2612_v12 = vpack.c.bf16 %v2248_v11, %v2247_v37  ;;  %v2246_v13 = vsel %vm2230_vm13, %v2222_v27, %v2238_v63 }
 0x1ef   : > { %v2607_v59 = vpack.c.bf16 %v2246_v13, %v2245_v58 }
 0x1f0   : > { %2624 = vst [vmem:[%s243_s22 + $0x8] sm:$0xff] %v2612_v12  }
 0x1f1   : > { %2608 = vst [vmem:[%s243_s22] sm:$0xff] %v2607_v59  }
 0x1f2   : > { %3304 = shalt.err (!%p3301_p2)
}
 0x1f3   : > { %s3305_s28 = scalar_lea.hbm %s3951_s26, 512  ;;  %s3309_s8 = scalar_lea.hbm %s4005_s3, 1024 }
 0x1f4   : > { %p3306_p0 = scmp.ne.s32.totalorder %s3951_s26, %s3305_s28  ;;  %p3310_p6 = scmp.lt.u32.totalorder %s3951_s26, %s4005_s3 }
 0x1f5   : > { %p3311_p7 = scmp.lt.u32.totalorder %s3309_s8, %s3305_s28  ;;  %p3313_p8 = scmp.lt.u32.totalorder %s3305_s28, %s3951_s26 }
 0x1f6   : > { %p3307_p4 = pnand %p3306_p0, %p4024_p12 }
 0x1f7   : > { %p3312_p11 = por %p3311_p7, %p3310_p6 }
 0x1f8   : > { %p3308_p13 = pneg %p3307_p4 }
 0x1f9   : > { %p3314_p1 = por %p3313_p8, %p3312_p11 }
 0x1fb   : > { %p3315_p10 = pnand %p3314_p1, %p3308_p13 }
 0x1fd   : > { %3318 = shalt.err (!%p3315_p10)
}
 0x1fe   : > { %s3385_s22 = smov 64   ;;  %s3386_s24 = smov 4  }
 0x1ff   : > { %3044 = dma.vmem_to_hbm [thread:$0]  (%p4024_p12), %s3953_s11, 512, %s3951_s26, %s2270_s15, %s3385_s22, %s3385_s22, %s3386_s24  }
 0x200 PF: > { %s2299_s18 = sand.u32 1, %s3357_s12   ;;  %p4025_p3 = scmp.ne.s32.totalorder %s4013_s23, 0 }
 0x201   : > { %p4026_p5 = scmp.ge.s32.totalorder %s3377_s17, 2  ;;  %s2300_s5 = scalar_lea.sflag [#allocation4], %s2299_s18 }
 0x203   : > { %p3058_p9 = pnand %p4026_p5, %p4025_p3 }
 0x205   : > { %3352 = dma.done.wait (!%p3058_p9), %s2300_s5, 512  }
 0x206   : > { %3354 = vsyncadd (!%p3058_p9), %s2300_s5, 4294966784  ;;  %s20_s17 = sadd.s32 1, %s3377_s17   ;;  %s4027_s12 = smov %s3361_s13 }
 0x207   : > { %p17_p2 = scmp.ge.s32.totalorder %s20_s17, 4   ;;  %s4028_s13 = smov %s3365_s14 }
 0x208   : > { %s4029_s14 = smov %s3556_s6  ;;  %s4030_s15 = smov %s3373_s16 }
 0x209   : > { %s4031_s16 = smov %s4033_s25  ;;  %19 = sbr.rel (!%p17_p2) target bundleno = 7 (0x7), region = 97 }
 0x210   :  { %2305 = vsyncpa [#allocation3], 1 }
 0x211   :  { %2307 = vsyncpa [#allocation3 + $0x1], 1 }
 0x212   :  { %2308 = vsyncpa [#allocation6], 1 }
 0x213   :  { %2309 = vsyncpa [#allocation4], 1 }
 0x214   :  { %2311 = vsyncpa [#allocation4 + $0x1], 1 }

</bundles_post_ra>
